<compile_context>
chip_gen: v7x
topology: tpu7x:2x2x1
jax: 0.10.0
libtpu: 0.0.40
codegen_flags: <defaults>
</compile_context>

<pallas_src>
import math
import functools

import jax
import jax.numpy as jnp
from jax.experimental import pallas as pl
from jax.experimental.pallas import tpu as pltpu


# ----------------------------------------------------------------------------
# Small helpers
# ----------------------------------------------------------------------------

_PIPELINE_OPTS = {"single_buffer_weights": True}   # runtime fallback switch


def _layernorm(v, w_row, b_row, eps):
    mu = jnp.mean(v, axis=-1, keepdims=True)
    var = jnp.mean((v - mu) ** 2, axis=-1, keepdims=True)
    return (v - mu) * jax.lax.rsqrt(var + eps) * w_row + b_row


def _gelu(x):
    # OpenAI gelu (matches gelu_impl in the PyTorch module).
    return 0.5 * x * (1.0 + jnp.tanh(0.7978845608028654 * x * (1.0 + 0.044715 * x * x)))


def _seq_tile(S, target=512):
    """Largest seq tile <= target dividing S, preferring 128/64/32/16/8 alignment."""
    if S <= target:
        return S
    for align in (128, 64, 32, 16, 8):
        t = (target // align) * align
        while t >= align:
            if S % t == 0:
                return t
            t -= align
    # Awkward S with no small divisor: fall back to the whole sequence.
    # (May be VMEM-heavy; pad S upstream for such shapes.)
    return S


def _ffn_tile(F, target=1024):
    """FFN (4H) tile: multiple of 128 (lane-valid) dividing F, else full F."""
    if F <= target:
        return F
    t = (target // 128) * 128
    while t >= 128:
        if F % t == 0:
            return t
        t -= 128
    return F


def _head_group(num_heads, head_dim):
    """Heads per attention grid step (batched einsum); aim for ~128 lanes."""
    cap = max(1, 128 // max(1, head_dim))
    for g in range(min(num_heads, cap), 0, -1):
        if num_heads % g == 0:
            return g
    return 1


@functools.lru_cache(maxsize=None)
def _vmem_limit_bytes():
    """Adapt the scoped-VMEM request to the chip (128 MiB parts vs v7x 64 MiB)."""
    default = 64 * 1024 * 1024
    try:
        info = pltpu.get_tpu_info()
        cap = getattr(info, "vmem_capacity_bytes", None)
        if not cap:
            return default
        return max(32 * 1024 * 1024, min(int(cap) - 16 * 1024 * 1024, 112 * 1024 * 1024))
    except Exception:
        return default


def _const_spec(shape):
    """BlockSpec for a grid-invariant (weight/bias/LN) block; single-buffered."""
    index_map = lambda *_: (0,) * len(shape)
    if _PIPELINE_OPTS["single_buffer_weights"]:
        try:
            return pl.BlockSpec(shape, index_map, pipeline_mode=pl.Buffered(1))
        except Exception:
            pass
    return pl.BlockSpec(shape, index_map)


# ----------------------------------------------------------------------------
# Pallas kernels
# ----------------------------------------------------------------------------

def ln_qkv_kernel(x_ref, ln1_w, ln1_b, wq, wk, wv, bq, bk, bv,
                  q_ref, k_ref, v_ref, *, eps):
    """Input layernorm + Q/K/V projections for one (batch, seq-tile)."""
    x = x_ref[0].astype(jnp.float32)                          # [TS, H]
    xln = _layernorm(x, ln1_w[...], ln1_b[...], eps).astype(jnp.bfloat16)
    q = jnp.dot(xln, wq[...], preferred_element_type=jnp.float32) + bq[...]
    k = jnp.dot(xln, wk[...], preferred_element_type=jnp.float32) + bk[...]
    v = jnp.dot(xln, wv[...], preferred_element_type=jnp.float32) + bv[...]
    q_ref[0] = q.astype(q_ref.dtype)                          # lane-dense [TS, H] bf16
    k_ref[0] = k.astype(k_ref.dtype)
    v_ref[0] = v.astype(v_ref.dtype)


def attention_kernel(q_ref, k_ref, v_ref, mask_ref, ctx_ref, *, sm_scale):
    """Masked softmax attention for one (batch, head-group, q-tile)."""
    q = q_ref[0]                                              # [G, TQ, hd] bf16
    k = k_ref[0]                                              # [G, S,  hd] bf16
    v = v_ref[0]                                              # [G, S,  hd] bf16
    mask = mask_ref[0, 0].astype(jnp.float32)                 # [TQ, S] (bf16 in HBM)
    neg = -10000.0 * (1.0 - mask)                             # hoisted additive term

    s = jnp.einsum("gqd,gkd->gqk", q, k,
                   preferred_element_type=jnp.float32)        # [G, TQ, S]
    s = s * sm_scale
    s = s * mask + neg                                        # == s*mask - 1e4*(1-mask)

    m = jnp.max(s, axis=-1, keepdims=True)
    p = jnp.exp(s - m)
    denom = jnp.sum(p, axis=-1, keepdims=True)
    p = p * pl.reciprocal(denom, approx=True)

    ctx = jnp.einsum("gqk,gkd->gqd", p.astype(jnp.bfloat16), v,
                     preferred_element_type=jnp.float32)      # [G, TQ, hd]
    ctx_ref[0] = ctx.astype(ctx_ref.dtype)


def post_attention_kernel(x_ref, ctx_ref,
                          dense_w, dense_b, ln2_w, ln2_b,
                          fc1_w, fc1_b, fc2_w, fc2_b,
                          fln_w, fln_b, out_ref,
                          h2_scr, acc_scr, *, eps, apply_final_ln):
    """Attn proj + residual + LN2 + FFN (4H dim streamed over the f axis) + residual."""
    f = pl.program_id(2)

    @pl.when(f == 0)
    def _():
        x = x_ref[0].astype(jnp.float32)                      # [TS, H] residual stream
        ctx = ctx_ref[0]                                      # [TS, H] bf16 merged heads
        attn = jnp.dot(ctx, dense_w[...], preferred_element_type=jnp.float32) + dense_b[...]
        r1 = x + attn
        acc_scr[...] = r1                                     # residual carried in accumulator
        h2_scr[...] = _layernorm(r1, ln2_w[...], ln2_b[...], eps).astype(jnp.bfloat16)

    # Streamed FFN tile: fc1 column block / fc2 row block for this f step.
    inter = jnp.dot(h2_scr[...], fc1_w[...], preferred_element_type=jnp.float32) + fc1_b[...]
    inter = _gelu(inter).astype(jnp.bfloat16)
    acc_scr[...] += jnp.dot(inter, fc2_w[...], preferred_element_type=jnp.float32)

    @pl.when(f == pl.num_programs(2) - 1)
    def _():
        out = acc_scr[...] + fc2_b[...]
        if apply_final_ln:
            out = _layernorm(out, fln_w[...], fln_b[...], eps)
        out_ref[0] = out.astype(out_ref.dtype)


# ----------------------------------------------------------------------------
# pallas_call wrappers
# ----------------------------------------------------------------------------

def run_ln_qkv(x, lp, *, eps):
    B, S, H = x.shape
    TS = _seq_tile(S, target=512)
    io_spec = pl.BlockSpec((1, TS, H), lambda b, t: (b, t, 0))
    out_sds = jax.ShapeDtypeStruct((B, S, H), jnp.bfloat16)
    return pl.pallas_call(
        functools.partial(ln_qkv_kernel, eps=eps),
        out_shape=(out_sds, out_sds, out_sds),
        grid_spec=pltpu.PrefetchScalarGridSpec(
            num_scalar_prefetch=0,
            grid=(B, S // TS),
            in_specs=[
                io_spec,
                _const_spec((1, H)), _const_spec((1, H)),             # ln1
                _const_spec((H, H)), _const_spec((H, H)), _const_spec((H, H)),   # Wq Wk Wv
                _const_spec((1, H)), _const_spec((1, H)), _const_spec((1, H)),   # bq bk bv
            ],
            out_specs=[io_spec, io_spec, io_spec],
        ),
        compiler_params=pltpu.CompilerParams(
            dimension_semantics=("parallel", "parallel"),
            vmem_limit_bytes=_vmem_limit_bytes()),
    )(x, lp["ln1_w"], lp["ln1_b"], lp["wq"], lp["wk"], lp["wv"],
      lp["bq"], lp["bk"], lp["bv"])


def run_attention(q, k, v, mask, *, head_dim, group):
    B, NH, S, HD = q.shape
    TQ = _seq_tile(S, target=256)
    G = group
    return pl.pallas_call(
        functools.partial(attention_kernel, sm_scale=1.0 / math.sqrt(head_dim)),
        out_shape=jax.ShapeDtypeStruct((B, NH, S, HD), jnp.bfloat16),
        grid_spec=pltpu.PrefetchScalarGridSpec(
            num_scalar_prefetch=0,
            # q-tile axis innermost: K/V index maps ignore t, so K/V blocks stay
            # resident across all q-tiles of a (batch, head-group).
            grid=(B, NH // G, S // TQ),
            in_specs=[
                pl.BlockSpec((1, G, TQ, HD), lambda b, hg, t: (b, hg, t, 0)),  # q
                pl.BlockSpec((1, G, S, HD), lambda b, hg, t: (b, hg, 0, 0)),   # k (resident)
                pl.BlockSpec((1, G, S, HD), lambda b, hg, t: (b, hg, 0, 0)),   # v (resident)
                pl.BlockSpec((1, 1, TQ, S), lambda b, hg, t: (b, 0, t, 0)),    # mask (bf16)
            ],
            out_specs=pl.BlockSpec((1, G, TQ, HD), lambda b, hg, t: (b, hg, t, 0)),
        ),
        compiler_params=pltpu.CompilerParams(
            dimension_semantics=("parallel", "parallel", "arbitrary"),
            vmem_limit_bytes=_vmem_limit_bytes()),
    )(q, k, v, mask)


def run_post_attention(x, ctx, lp, fln_w, fln_b, *, eps, apply_final_ln):
    B, S, H = x.shape
    F = 4 * H
    TS = _seq_tile(S, target=512)
    TF = _ffn_tile(F, target=1024)
    NF = F // TF
    io_spec = pl.BlockSpec((1, TS, H), lambda b, t, f: (b, t, 0))
    return pl.pallas_call(
        functools.partial(post_attention_kernel, eps=eps, apply_final_ln=apply_final_ln),
        out_shape=jax.ShapeDtypeStruct((B, S, H), x.dtype),
        grid_spec=pltpu.PrefetchScalarGridSpec(
            num_scalar_prefetch=0,
            grid=(B, S // TS, NF),                      # FFN reduction axis last
            in_specs=[
                io_spec,                                # residual x (resident across f)
                io_spec,                                # merged context (resident across f)
                _const_spec((H, H)), _const_spec((1, H)),      # dense
                _const_spec((1, H)), _const_spec((1, H)),      # ln2
                pl.BlockSpec((H, TF), lambda b, t, f: (0, f)),  # fc1_w streamed over f
                pl.BlockSpec((1, TF), lambda b, t, f: (0, f)),  # fc1_b streamed over f
                pl.BlockSpec((TF, H), lambda b, t, f: (f, 0)),  # fc2_w streamed over f
                _const_spec((1, H)),                            # fc2_b
                _const_spec((1, H)), _const_spec((1, H)),       # final LN (maybe unused)
            ],
            out_specs=io_spec,
            scratch_shapes=[pltpu.VMEM((TS, H), jnp.bfloat16),  # h2 (post-LN2 acts)
                            pltpu.VMEM((TS, H), jnp.float32)],  # residual + MLP accumulator
        ),
        compiler_params=pltpu.CompilerParams(
            dimension_semantics=("parallel", "parallel", "arbitrary"),
            vmem_limit_bytes=_vmem_limit_bytes()),
    )(x, ctx, lp["dense_w"], lp["dense_b"], lp["ln2_w"], lp["ln2_b"],
      lp["fc1_w"], lp["fc1_b"], lp["fc2_w"], lp["fc2_b"], fln_w, fln_b)


def run_transformer_layer(x, mask, lp, fln_w, fln_b, *, num_heads, eps, apply_final_ln):
    """One GPT2TransformerLayer (optionally fusing the model's final layernorm)."""
    B, S, H = x.shape
    hd = H // num_heads

    # 1) input layernorm + Q/K/V projections (Pallas; three lane-dense outputs).
    q, k, v = run_ln_qkv(x, lp, eps=eps)                      # each [B,S,H] bf16

    # Head split: XLA layout glue between calls.
    # TODO(synk): eliminate these transposes by grouping heads into 128-wide lane
    #             blocks read straight out of [B,S,H]; needs in-kernel lane reshapes.
    def to_heads(t):
        return t.reshape(B, S, num_heads, hd).transpose(0, 2, 1, 3)
    qh, kh, vh = to_heads(q), to_heads(k), to_heads(v)

    # 2) grouped-head masked softmax attention (Pallas).
    G = _head_group(num_heads, hd)
    ctx = run_attention(qh, kh, vh, mask, head_dim=hd, group=G)   # [B,NH,S,hd] bf16
    ctx = ctx.transpose(0, 2, 1, 3).reshape(B, S, H)              # merge heads (XLA)

    # 3) dense + residual + LN + streamed FFN + residual (+ fused final LN) (Pallas).
    return run_post_attention(x, ctx, lp, fln_w, fln_b, eps=eps,
                              apply_final_ln=apply_final_ln)


def gpt2_transformer_forward(hidden_states, position_ids, attention_mask, params,
                             *, num_heads, eps=1e-5):
    """Mirrors GPT2Transformer.forward with no mems / no relative encoding."""
    B, S, H = hidden_states.shape
    # memory_length == 0; 0/1 mask values are exact in bf16 (halves mask DMA).
    mask = attention_mask[:, :, :, -S:].astype(jnp.bfloat16)
    pos_emb = jnp.take(params["pos_table"], position_ids, axis=0)   # [B,S,H]
    x = hidden_states + pos_emb                # embedding dropout p=0 -> identity

    n_layers = len(params["layers"])
    for i, lp in enumerate(params["layers"]):
        x = run_transformer_layer(
            x, mask, lp, params["final_ln_w"], params["final_ln_b"],
            num_heads=num_heads, eps=eps,
            apply_final_ln=(i == n_layers - 1))          # final LN fused into last layer
    return x
    # TODO(synk): mems update path (max_memory_length > 0) not implemented; the
    # module returns only `output` when max_memory_length == 0.


# ----------------------------------------------------------------------------
# Parameter init (PyTorch-module shapes) and one-time kernel-ready prep
# ----------------------------------------------------------------------------

def init_params(key, *, num_layers, hidden_size, max_sequence_length,
                init_method_std=0.02):
    H = hidden_size
    out_std = init_method_std / math.sqrt(2.0 * num_layers)   # scaled_init_method
    keys = jax.random.split(key, 2 + num_layers)

    pos_table = init_method_std * jax.random.normal(
        keys[0], (max_sequence_length, H), jnp.float32)

    layers = []
    for li in range(num_layers):
        ks = jax.random.split(keys[2 + li], 4)
        layers.append(dict(
            ln1_w=jnp.ones((1, H), jnp.float32),
            ln1_b=jnp.zeros((1, H), jnp.float32),
            qkv_w=init_method_std * jax.random.normal(ks[0], (H, 3 * H), jnp.float32),
            qkv_b=jnp.zeros((1, 3 * H), jnp.float32),
            dense_w=out_std * jax.random.normal(ks[1], (H, H), jnp.float32),
            dense_b=jnp.zeros((1, H), jnp.float32),
            ln2_w=jnp.ones((1, H), jnp.float32),
            ln2_b=jnp.zeros((1, H), jnp.float32),
            fc1_w=init_method_std * jax.random.normal(ks[2], (H, 4 * H), jnp.float32),
            fc1_b=jnp.zeros((1, 4 * H), jnp.float32),
            fc2_w=out_std * jax.random.normal(ks[3], (4 * H, H), jnp.float32),
            fc2_b=jnp.zeros((1, H), jnp.float32),
        ))

    return dict(
        pos_table=pos_table,
        layers=layers,
        final_ln_w=jnp.ones((1, H), jnp.float32),
        final_ln_b=jnp.zeros((1, H), jnp.float32),
    )


def prepare_params(params):
    """One-time prep: bf16 weights, QKV weight/bias pre-split into Q/K/V."""
    bf16 = jnp.bfloat16
    H = params["final_ln_w"].shape[-1]
    layers = []
    for lp in params["layers"]:
        qkv_w, qkv_b = lp["qkv_w"], lp["qkv_b"]
        layers.append(dict(
            ln1_w=lp["ln1_w"], ln1_b=lp["ln1_b"],
            wq=qkv_w[:, 0 * H:1 * H].astype(bf16),
            wk=qkv_w[:, 1 * H:2 * H].astype(bf16),
            wv=qkv_w[:, 2 * H:3 * H].astype(bf16),
            bq=qkv_b[:, 0 * H:1 * H], bk=qkv_b[:, 1 * H:2 * H], bv=qkv_b[:, 2 * H:3 * H],
            dense_w=lp["dense_w"].astype(bf16), dense_b=lp["dense_b"],
            ln2_w=lp["ln2_w"], ln2_b=lp["ln2_b"],
            fc1_w=lp["fc1_w"].astype(bf16), fc1_b=lp["fc1_b"],
            fc2_w=lp["fc2_w"].astype(bf16), fc2_b=lp["fc2_b"],
        ))
    return dict(pos_table=params["pos_table"], layers=layers,
                final_ln_w=params["final_ln_w"], final_ln_b=params["final_ln_b"])


# ----------------------------------------------------------------------------
# Pure-JAX f32 reference (for correctness check)
# ----------------------------------------------------------------------------

def _ref_forward(hidden_states, position_ids, attention_mask, params, *, num_heads, eps=1e-5):
    B, S, H = hidden_states.shape
    hd = H // num_heads
    mask = attention_mask[:, :, :, -S:].astype(jnp.float32)   # [B,1,S,S]

    def ln(v, w, b):
        mu = jnp.mean(v, -1, keepdims=True)
        var = jnp.mean((v - mu) ** 2, -1, keepdims=True)
        return (v - mu) / jnp.sqrt(var + eps) * w + b

    x = hidden_states + jnp.take(params["pos_table"], position_ids, axis=0)
    for lp in params["layers"]:
        xln = ln(x, lp["ln1_w"][0], lp["ln1_b"][0])
        qkv = xln @ lp["qkv_w"] + lp["qkv_b"][0]
        q, k, v = jnp.split(qkv, 3, axis=-1)
        def heads(t):
            return t.reshape(B, S, num_heads, hd).transpose(0, 2, 1, 3)
        qh, kh, vh = heads(q), heads(k), heads(v)
        sc = jnp.einsum("bnqd,bnkd->bnqk", qh, kh) / math.sqrt(hd)
        sc = sc * mask - 10000.0 * (1.0 - mask)
        p = jax.nn.softmax(sc, axis=-1)
        ctx = jnp.einsum("bnqk,bnkd->bnqd", p, vh).transpose(0, 2, 1, 3).reshape(B, S, H)
        attn = ctx @ lp["dense_w"] + lp["dense_b"][0]
        r1 = x + attn
        h2 = ln(r1, lp["ln2_w"][0], lp["ln2_b"][0])
        inter = h2 @ lp["fc1_w"] + lp["fc1_b"][0]
        inter = 0.5 * inter * (1.0 + jnp.tanh(0.7978845608028654 * inter * (1.0 + 0.044715 * inter * inter)))
        x = r1 + inter @ lp["fc2_w"] + lp["fc2_b"][0]
    return ln(x, params["final_ln_w"][0], params["final_ln_b"][0])


# ----------------------------------------------------------------------------
# Main
# ----------------------------------------------------------------------------

if __name__ == "__main__":
    B, S, H, NH = 2, 8, 32, 4
    NUM_LAYERS = 2
    MAX_SEQ = 16

    key = jax.random.PRNGKey(0)
    k_params, k_hid = jax.random.split(key)

    params = init_params(k_params, num_layers=NUM_LAYERS, hidden_size=H,
                         max_sequence_length=MAX_SEQ)
    prepared = prepare_params(params)          # one-time bf16 / QKV-split prep

    hidden_states = jax.random.normal(k_hid, (B, S, H), jnp.float32)
    position_ids = jnp.broadcast_to(jnp.arange(S, dtype=jnp.int32), (B, S))
    # causal left-to-right mask [B, 1, S, S]
    attention_mask = jnp.broadcast_to(
        jnp.tril(jnp.ones((S, S), jnp.float32))[None, None, :, :], (B, 1, S, S))

    def _forward():
        return gpt2_transformer_forward(hidden_states, position_ids, attention_mask,
                                        prepared, num_heads=NH)

    try:
        out = jax.block_until_ready(_forward())
    except Exception:
        # Fallback: this JAX build may not accept single-buffered pipeline_mode
        # on grid-invariant BlockSpecs; retry with default double-buffering.
        _PIPELINE_OPTS["single_buffer_weights"] = False
        out = jax.block_until_ready(_forward())

    ref = _ref_forward(hidden_states, position_ids, attention_mask, params, num_heads=NH)
    assert out.shape == (B, S, H)
    # bf16 matmul operands (+ approx softmax reciprocal) => relaxed tolerance vs f32 ref.
    max_err = float(jnp.max(jnp.abs(out - ref)))
    assert jnp.allclose(out, ref, atol=2e-2, rtol=2e-2), f"mismatch vs reference (max abs err={max_err})"

    print("KERNEL_OK")
</pallas_src>

<mosaic_0001>
module attributes {stable_mosaic.version = 11 : i64} {
  func.func @ln_qkv_kernel(%arg0: i32, %arg1: i32, %arg2: memref<1x8x32xf32, #tpu.memory_space<vmem>>, %arg3: memref<1x32xf32, #tpu.memory_space<vmem>>, %arg4: memref<1x32xf32, #tpu.memory_space<vmem>>, %arg5: memref<32x32xbf16, #tpu.memory_space<vmem>>, %arg6: memref<32x32xbf16, #tpu.memory_space<vmem>>, %arg7: memref<32x32xbf16, #tpu.memory_space<vmem>>, %arg8: memref<1x32xf32, #tpu.memory_space<vmem>>, %arg9: memref<1x32xf32, #tpu.memory_space<vmem>>, %arg10: memref<1x32xf32, #tpu.memory_space<vmem>>, %arg11: memref<1x8x32xbf16, #tpu.memory_space<vmem>>, %arg12: memref<1x8x32xbf16, #tpu.memory_space<vmem>>, %arg13: memref<1x8x32xbf16, #tpu.memory_space<vmem>>) attributes {dimension_semantics = [#tpu.dimension_semantics<parallel>, #tpu.dimension_semantics<parallel>], iteration_bounds = array<i64: 2, 1>, scalar_prefetch = 0 : i64, scratch_operands = 0 : i64, tpu.core_type = #tpu.core_type<tc>, window_params = [{transform_indices = @transform_0, window_bounds = array<i64: 1, 8, 32>}, {pipeline_mode = #tpu.pipeline_mode<synchronous>, transform_indices = @transform_1, window_bounds = array<i64: 1, 32>}, {pipeline_mode = #tpu.pipeline_mode<synchronous>, transform_indices = @transform_2, window_bounds = array<i64: 1, 32>}, {pipeline_mode = #tpu.pipeline_mode<synchronous>, transform_indices = @transform_3, window_bounds = array<i64: 32, 32>}, {pipeline_mode = #tpu.pipeline_mode<synchronous>, transform_indices = @transform_4, window_bounds = array<i64: 32, 32>}, {pipeline_mode = #tpu.pipeline_mode<synchronous>, transform_indices = @transform_5, window_bounds = array<i64: 32, 32>}, {pipeline_mode = #tpu.pipeline_mode<synchronous>, transform_indices = @transform_6, window_bounds = array<i64: 1, 32>}, {pipeline_mode = #tpu.pipeline_mode<synchronous>, transform_indices = @transform_7, window_bounds = array<i64: 1, 32>}, {pipeline_mode = #tpu.pipeline_mode<synchronous>, transform_indices = @transform_8, window_bounds = array<i64: 1, 32>}, {transform_indices = @transform_9, window_bounds = array<i64: 1, 8, 32>}, {transform_indices = @transform_10, window_bounds = array<i64: 1, 8, 32>}, {transform_indices = @transform_11, window_bounds = array<i64: 1, 8, 32>}]} {
    %c0 = arith.constant 0 : index
    %c0_0 = arith.constant 0 : index
    %c0_1 = arith.constant 0 : index
    %0 = vector.load %arg2[%c0, %c0_0, %c0_1] : memref<1x8x32xf32, #tpu.memory_space<vmem>>, vector<1x8x32xf32>
    %1 = vector.shape_cast %0 : vector<1x8x32xf32> to vector<8x32xf32>
    %c0_2 = arith.constant 0 : index
    %c0_3 = arith.constant 0 : index
    %2 = vector.load %arg3[%c0_2, %c0_3] : memref<1x32xf32, #tpu.memory_space<vmem>>, vector<1x32xf32>
    %c0_4 = arith.constant 0 : index
    %c0_5 = arith.constant 0 : index
    %3 = vector.load %arg4[%c0_4, %c0_5] : memref<1x32xf32, #tpu.memory_space<vmem>>, vector<1x32xf32>
    %cst = arith.constant dense<0.000000e+00> : vector<8xf32>
    %4 = vector.multi_reduction <add>, %1, %cst [1] : vector<8x32xf32> to vector<8xf32>
    %5 = vector.shape_cast %4 : vector<8xf32> to vector<8x1xf32>
    %cst_6 = arith.constant 3.200000e+01 : f32
    %6 = vector.broadcast %cst_6 : f32 to vector<8x1xf32>
    %7 = arith.divf %5, %6 : vector<8x1xf32>
    %8 = vector.broadcast %7 : vector<8x1xf32> to vector<8x32xf32>
    %9 = arith.subf %1, %8 : vector<8x32xf32>
    %10 = arith.mulf %9, %9 : vector<8x32xf32>
    %cst_7 = arith.constant dense<0.000000e+00> : vector<8xf32>
    %11 = vector.multi_reduction <add>, %10, %cst_7 [1] : vector<8x32xf32> to vector<8xf32>
    %12 = vector.shape_cast %11 : vector<8xf32> to vector<8x1xf32>
    %cst_8 = arith.constant 3.200000e+01 : f32
    %13 = vector.broadcast %cst_8 : f32 to vector<8x1xf32>
    %14 = arith.divf %12, %13 : vector<8x1xf32>
    %15 = vector.broadcast %7 : vector<8x1xf32> to vector<8x32xf32>
    %16 = arith.subf %1, %15 : vector<8x32xf32>
    %cst_9 = arith.constant 9.99999974E-6 : f32
    %17 = vector.broadcast %cst_9 : f32 to vector<8x1xf32>
    %18 = arith.addf %14, %17 : vector<8x1xf32>
    %19 = math.rsqrt %18 : vector<8x1xf32>
    %20 = vector.broadcast %19 : vector<8x1xf32> to vector<8x32xf32>
    %21 = arith.mulf %16, %20 : vector<8x32xf32>
    %22 = vector.broadcast %2 : vector<1x32xf32> to vector<8x32xf32>
    %23 = arith.mulf %21, %22 : vector<8x32xf32>
    %24 = vector.broadcast %3 : vector<1x32xf32> to vector<8x32xf32>
    %25 = arith.addf %23, %24 : vector<8x32xf32>
    %26 = arith.truncf %25 : vector<8x32xf32> to vector<8x32xbf16>
    %c0_10 = arith.constant 0 : index
    %c0_11 = arith.constant 0 : index
    %27 = vector.load %arg5[%c0_10, %c0_11] : memref<32x32xbf16, #tpu.memory_space<vmem>>, vector<32x32xbf16>
    %cst_12 = arith.constant dense<0.000000e+00> : vector<8x32xf32>
    %28 = tpu.matmul %26, %27, %cst_12 {dimension_numbers = #tpu.dot_dimension_numbers<[1], [0], [0], [1], [0, 0, 1, 1], [], []>} : vector<8x32xbf16>, vector<32x32xbf16>, vector<8x32xf32> -> vector<8x32xf32>
    %c0_13 = arith.constant 0 : index
    %c0_14 = arith.constant 0 : index
    %29 = vector.load %arg8[%c0_13, %c0_14] : memref<1x32xf32, #tpu.memory_space<vmem>>, vector<1x32xf32>
    %30 = vector.broadcast %29 : vector<1x32xf32> to vector<8x32xf32>
    %31 = arith.addf %28, %30 : vector<8x32xf32>
    %c0_15 = arith.constant 0 : index
    %c0_16 = arith.constant 0 : index
    %32 = vector.load %arg6[%c0_15, %c0_16] : memref<32x32xbf16, #tpu.memory_space<vmem>>, vector<32x32xbf16>
    %cst_17 = arith.constant dense<0.000000e+00> : vector<8x32xf32>
    %33 = tpu.matmul %26, %32, %cst_17 {dimension_numbers = #tpu.dot_dimension_numbers<[1], [0], [0], [1], [0, 0, 1, 1], [], []>} : vector<8x32xbf16>, vector<32x32xbf16>, vector<8x32xf32> -> vector<8x32xf32>
    %c0_18 = arith.constant 0 : index
    %c0_19 = arith.constant 0 : index
    %34 = vector.load %arg9[%c0_18, %c0_19] : memref<1x32xf32, #tpu.memory_space<vmem>>, vector<1x32xf32>
    %35 = vector.broadcast %34 : vector<1x32xf32> to vector<8x32xf32>
    %36 = arith.addf %33, %35 : vector<8x32xf32>
    %c0_20 = arith.constant 0 : index
    %c0_21 = arith.constant 0 : index
    %37 = vector.load %arg7[%c0_20, %c0_21] : memref<32x32xbf16, #tpu.memory_space<vmem>>, vector<32x32xbf16>
    %cst_22 = arith.constant dense<0.000000e+00> : vector<8x32xf32>
    %38 = tpu.matmul %26, %37, %cst_22 {dimension_numbers = #tpu.dot_dimension_numbers<[1], [0], [0], [1], [0, 0, 1, 1], [], []>} : vector<8x32xbf16>, vector<32x32xbf16>, vector<8x32xf32> -> vector<8x32xf32>
    %c0_23 = arith.constant 0 : index
    %c0_24 = arith.constant 0 : index
    %39 = vector.load %arg10[%c0_23, %c0_24] : memref<1x32xf32, #tpu.memory_space<vmem>>, vector<1x32xf32>
    %40 = vector.broadcast %39 : vector<1x32xf32> to vector<8x32xf32>
    %41 = arith.addf %38, %40 : vector<8x32xf32>
    %42 = arith.truncf %31 : vector<8x32xf32> to vector<8x32xbf16>
    %c0_25 = arith.constant 0 : index
    %c0_26 = arith.constant 0 : index
    %c0_27 = arith.constant 0 : index
    %43 = vector.load %arg11[%c0_25, %c0_26, %c0_27] : memref<1x8x32xbf16, #tpu.memory_space<vmem>>, vector<1x8x32xbf16>
    %44 = vector.shape_cast %43 : vector<1x8x32xbf16> to vector<8x32xbf16>
    %45 = vector.shape_cast %42 : vector<8x32xbf16> to vector<1x8x32xbf16>
    tpu.vector_store %arg11[%c0_25, %c0_26, %c0_27], %45 {strides = array<i32>} : memref<1x8x32xbf16, #tpu.memory_space<vmem>>, vector<1x8x32xbf16>,
    %46 = arith.truncf %36 : vector<8x32xf32> to vector<8x32xbf16>
    %c0_28 = arith.constant 0 : index
    %c0_29 = arith.constant 0 : index
    %c0_30 = arith.constant 0 : index
    %47 = vector.load %arg12[%c0_28, %c0_29, %c0_30] : memref<1x8x32xbf16, #tpu.memory_space<vmem>>, vector<1x8x32xbf16>
    %48 = vector.shape_cast %47 : vector<1x8x32xbf16> to vector<8x32xbf16>
    %49 = vector.shape_cast %46 : vector<8x32xbf16> to vector<1x8x32xbf16>
    tpu.vector_store %arg12[%c0_28, %c0_29, %c0_30], %49 {strides = array<i32>} : memref<1x8x32xbf16, #tpu.memory_space<vmem>>, vector<1x8x32xbf16>,
    %50 = arith.truncf %41 : vector<8x32xf32> to vector<8x32xbf16>
    %c0_31 = arith.constant 0 : index
    %c0_32 = arith.constant 0 : index
    %c0_33 = arith.constant 0 : index
    %51 = vector.load %arg13[%c0_31, %c0_32, %c0_33] : memref<1x8x32xbf16, #tpu.memory_space<vmem>>, vector<1x8x32xbf16>
    %52 = vector.shape_cast %51 : vector<1x8x32xbf16> to vector<8x32xbf16>
    %53 = vector.shape_cast %50 : vector<8x32xbf16> to vector<1x8x32xbf16>
    tpu.vector_store %arg13[%c0_31, %c0_32, %c0_33], %53 {strides = array<i32>} : memref<1x8x32xbf16, #tpu.memory_space<vmem>>, vector<1x8x32xbf16>,
    return
  }
  func.func @transform_0(%arg0: i32, %arg1: i32) -> (i32, i32, i32) {
    %c0_i32 = arith.constant 0 : i32
    %c0_i32_0 = arith.constant 0 : i32
    return %arg0, %arg1, %c0_i32 : i32, i32, i32
  }
  func.func @transform_1(%arg0: i32, %arg1: i32) -> (i32, i32) {
    %c0_i32 = arith.constant 0 : i32
    %c0_i32_0 = arith.constant 0 : i32
    %c0_i32_1 = arith.constant 0 : i32
    return %c0_i32, %c0_i32_0 : i32, i32
  }
  func.func @transform_2(%arg0: i32, %arg1: i32) -> (i32, i32) {
    %c0_i32 = arith.constant 0 : i32
    %c0_i32_0 = arith.constant 0 : i32
    %c0_i32_1 = arith.constant 0 : i32
    return %c0_i32, %c0_i32_0 : i32, i32
  }
  func.func @transform_3(%arg0: i32, %arg1: i32) -> (i32, i32) {
    %c0_i32 = arith.constant 0 : i32
    %c0_i32_0 = arith.constant 0 : i32
    %c0_i32_1 = arith.constant 0 : i32
    return %c0_i32, %c0_i32_0 : i32, i32
  }
  func.func @transform_4(%arg0: i32, %arg1: i32) -> (i32, i32) {
    %c0_i32 = arith.constant 0 : i32
    %c0_i32_0 = arith.constant 0 : i32
    %c0_i32_1 = arith.constant 0 : i32
    return %c0_i32, %c0_i32_0 : i32, i32
  }
  func.func @transform_5(%arg0: i32, %arg1: i32) -> (i32, i32) {
    %c0_i32 = arith.constant 0 : i32
    %c0_i32_0 = arith.constant 0 : i32
    %c0_i32_1 = arith.constant 0 : i32
    return %c0_i32, %c0_i32_0 : i32, i32
  }
  func.func @transform_6(%arg0: i32, %arg1: i32) -> (i32, i32) {
    %c0_i32 = arith.constant 0 : i32
    %c0_i32_0 = arith.constant 0 : i32
    %c0_i32_1 = arith.constant 0 : i32
    return %c0_i32, %c0_i32_0 : i32, i32
  }
  func.func @transform_7(%arg0: i32, %arg1: i32) -> (i32, i32) {
    %c0_i32 = arith.constant 0 : i32
    %c0_i32_0 = arith.constant 0 : i32
    %c0_i32_1 = arith.constant 0 : i32
    return %c0_i32, %c0_i32_0 : i32, i32
  }
  func.func @transform_8(%arg0: i32, %arg1: i32) -> (i32, i32) {
    %c0_i32 = arith.constant 0 : i32
    %c0_i32_0 = arith.constant 0 : i32
    %c0_i32_1 = arith.constant 0 : i32
    return %c0_i32, %c0_i32_0 : i32, i32
  }
  func.func @transform_9(%arg0: i32, %arg1: i32) -> (i32, i32, i32) {
    %c0_i32 = arith.constant 0 : i32
    %c0_i32_0 = arith.constant 0 : i32
    return %arg0, %arg1, %c0_i32 : i32, i32, i32
  }
  func.func @transform_10(%arg0: i32, %arg1: i32) -> (i32, i32, i32) {
    %c0_i32 = arith.constant 0 : i32
    %c0_i32_0 = arith.constant 0 : i32
    return %arg0, %arg1, %c0_i32 : i32, i32, i32
  }
  func.func @transform_11(%arg0: i32, %arg1: i32) -> (i32, i32, i32) {
    %c0_i32 = arith.constant 0 : i32
    %c0_i32_0 = arith.constant 0 : i32
    return %arg0, %arg1, %c0_i32 : i32, i32, i32
  }
}

module attributes {stable_mosaic.version = 11 : i64} {
  func.func @ln_qkv_kernel(%arg0: i32, %arg1: i32, %arg2: memref<1x8x32xf32, #tpu.memory_space<vmem>>, %arg3: memref<1x32xf32, #tpu.memory_space<vmem>>, %arg4: memref<1x32xf32, #tpu.memory_space<vmem>>, %arg5: memref<32x32xbf16, #tpu.memory_space<vmem>>, %arg6: memref<32x32xbf16, #tpu.memory_space<vmem>>, %arg7: memref<32x32xbf16, #tpu.memory_space<vmem>>, %arg8: memref<1x32xf32, #tpu.memory_space<vmem>>, %arg9: memref<1x32xf32, #tpu.memory_space<vmem>>, %arg10: memref<1x32xf32, #tpu.memory_space<vmem>>, %arg11: memref<1x8x32xbf16, #tpu.memory_space<vmem>>, %arg12: memref<1x8x32xbf16, #tpu.memory_space<vmem>>, %arg13: memref<1x8x32xbf16, #tpu.memory_space<vmem>>) attributes {dimension_semantics = [#tpu.dimension_semantics<parallel>, #tpu.dimension_semantics<parallel>], iteration_bounds = array<i64: 2, 1>, scalar_prefetch = 0 : i64, scratch_operands = 0 : i64, tpu.core_type = #tpu.core_type<tc>, window_params = [{transform_indices = @transform_0, window_bounds = array<i64: 1, 8, 32>}, {pipeline_mode = #tpu.pipeline_mode<synchronous>, transform_indices = @transform_1, window_bounds = array<i64: 1, 32>}, {pipeline_mode = #tpu.pipeline_mode<synchronous>, transform_indices = @transform_2, window_bounds = array<i64: 1, 32>}, {pipeline_mode = #tpu.pipeline_mode<synchronous>, transform_indices = @transform_3, window_bounds = array<i64: 32, 32>}, {pipeline_mode = #tpu.pipeline_mode<synchronous>, transform_indices = @transform_4, window_bounds = array<i64: 32, 32>}, {pipeline_mode = #tpu.pipeline_mode<synchronous>, transform_indices = @transform_5, window_bounds = array<i64: 32, 32>}, {pipeline_mode = #tpu.pipeline_mode<synchronous>, transform_indices = @transform_6, window_bounds = array<i64: 1, 32>}, {pipeline_mode = #tpu.pipeline_mode<synchronous>, transform_indices = @transform_7, window_bounds = array<i64: 1, 32>}, {pipeline_mode = #tpu.pipeline_mode<synchronous>, transform_indices = @transform_8, window_bounds = array<i64: 1, 32>}, {transform_indices = @transform_9, window_bounds = array<i64: 1, 8, 32>}, {transform_indices = @transform_10, window_bounds = array<i64: 1, 8, 32>}, {transform_indices = @transform_11, window_bounds = array<i64: 1, 8, 32>}]} {
    %c0 = arith.constant 0 : index
    %c0_0 = arith.constant 0 : index
    %c0_1 = arith.constant 0 : index
    %0 = vector.load %arg2[%c0, %c0_0, %c0_1] : memref<1x8x32xf32, #tpu.memory_space<vmem>>, vector<1x8x32xf32>
    %1 = vector.shape_cast %0 : vector<1x8x32xf32> to vector<8x32xf32>
    %c0_2 = arith.constant 0 : index
    %c0_3 = arith.constant 0 : index
    %2 = vector.load %arg3[%c0_2, %c0_3] : memref<1x32xf32, #tpu.memory_space<vmem>>, vector<1x32xf32>
    %c0_4 = arith.constant 0 : index
    %c0_5 = arith.constant 0 : index
    %3 = vector.load %arg4[%c0_4, %c0_5] : memref<1x32xf32, #tpu.memory_space<vmem>>, vector<1x32xf32>
    %cst = arith.constant dense<0.000000e+00> : vector<8xf32>
    %4 = vector.multi_reduction <add>, %1, %cst [1] : vector<8x32xf32> to vector<8xf32>
    %5 = vector.shape_cast %4 : vector<8xf32> to vector<8x1xf32>
    %cst_6 = arith.constant 3.200000e+01 : f32
    %6 = vector.broadcast %cst_6 : f32 to vector<8x1xf32>
    %7 = arith.divf %5, %6 : vector<8x1xf32>
    %8 = vector.broadcast %7 : vector<8x1xf32> to vector<8x32xf32>
    %9 = arith.subf %1, %8 : vector<8x32xf32>
    %10 = arith.mulf %9, %9 : vector<8x32xf32>
    %cst_7 = arith.constant dense<0.000000e+00> : vector<8xf32>
    %11 = vector.multi_reduction <add>, %10, %cst_7 [1] : vector<8x32xf32> to vector<8xf32>
    %12 = vector.shape_cast %11 : vector<8xf32> to vector<8x1xf32>
    %cst_8 = arith.constant 3.200000e+01 : f32
    %13 = vector.broadcast %cst_8 : f32 to vector<8x1xf32>
    %14 = arith.divf %12, %13 : vector<8x1xf32>
    %15 = vector.broadcast %7 : vector<8x1xf32> to vector<8x32xf32>
    %16 = arith.subf %1, %15 : vector<8x32xf32>
    %cst_9 = arith.constant 9.99999974E-6 : f32
    %17 = vector.broadcast %cst_9 : f32 to vector<8x1xf32>
    %18 = arith.addf %14, %17 : vector<8x1xf32>
    %19 = math.rsqrt %18 : vector<8x1xf32>
    %20 = vector.broadcast %19 : vector<8x1xf32> to vector<8x32xf32>
    %21 = arith.mulf %16, %20 : vector<8x32xf32>
    %22 = vector.broadcast %2 : vector<1x32xf32> to vector<8x32xf32>
    %23 = arith.mulf %21, %22 : vector<8x32xf32>
    %24 = vector.broadcast %3 : vector<1x32xf32> to vector<8x32xf32>
    %25 = arith.addf %23, %24 : vector<8x32xf32>
    %26 = arith.truncf %25 : vector<8x32xf32> to vector<8x32xbf16>
    %c0_10 = arith.constant 0 : index
    %c0_11 = arith.constant 0 : index
    %27 = vector.load %arg5[%c0_10, %c0_11] : memref<32x32xbf16, #tpu.memory_space<vmem>>, vector<32x32xbf16>
    %cst_12 = arith.constant dense<0.000000e+00> : vector<8x32xf32>
    %28 = tpu.matmul %26, %27, %cst_12 {dimension_numbers = #tpu.dot_dimension_numbers<[1], [0], [0], [1], [0, 0, 1, 1], [], []>} : vector<8x32xbf16>, vector<32x32xbf16>, vector<8x32xf32> -> vector<8x32xf32>
    %c0_13 = arith.constant 0 : index
    %c0_14 = arith.constant 0 : index
    %29 = vector.load %arg8[%c0_13, %c0_14] : memref<1x32xf32, #tpu.memory_space<vmem>>, vector<1x32xf32>
    %30 = vector.broadcast %29 : vector<1x32xf32> to vector<8x32xf32>
    %31 = arith.addf %28, %30 : vector<8x32xf32>
    %c0_15 = arith.constant 0 : index
    %c0_16 = arith.constant 0 : index
    %32 = vector.load %arg6[%c0_15, %c0_16] : memref<32x32xbf16, #tpu.memory_space<vmem>>, vector<32x32xbf16>
    %cst_17 = arith.constant dense<0.000000e+00> : vector<8x32xf32>
    %33 = tpu.matmul %26, %32, %cst_17 {dimension_numbers = #tpu.dot_dimension_numbers<[1], [0], [0], [1], [0, 0, 1, 1], [], []>} : vector<8x32xbf16>, vector<32x32xbf16>, vector<8x32xf32> -> vector<8x32xf32>
    %c0_18 = arith.constant 0 : index
    %c0_19 = arith.constant 0 : index
    %34 = vector.load %arg9[%c0_18, %c0_19] : memref<1x32xf32, #tpu.memory_space<vmem>>, vector<1x32xf32>
    %35 = vector.broadcast %34 : vector<1x32xf32> to vector<8x32xf32>
    %36 = arith.addf %33, %35 : vector<8x32xf32>
    %c0_20 = arith.constant 0 : index
    %c0_21 = arith.constant 0 : index
    %37 = vector.load %arg7[%c0_20, %c0_21] : memref<32x32xbf16, #tpu.memory_space<vmem>>, vector<32x32xbf16>
    %cst_22 = arith.constant dense<0.000000e+00> : vector<8x32xf32>
    %38 = tpu.matmul %26, %37, %cst_22 {dimension_numbers = #tpu.dot_dimension_numbers<[1], [0], [0], [1], [0, 0, 1, 1], [], []>} : vector<8x32xbf16>, vector<32x32xbf16>, vector<8x32xf32> -> vector<8x32xf32>
    %c0_23 = arith.constant 0 : index
    %c0_24 = arith.constant 0 : index
    %39 = vector.load %arg10[%c0_23, %c0_24] : memref<1x32xf32, #tpu.memory_space<vmem>>, vector<1x32xf32>
    %40 = vector.broadcast %39 : vector<1x32xf32> to vector<8x32xf32>
    %41 = arith.addf %38, %40 : vector<8x32xf32>
    %42 = arith.truncf %31 : vector<8x32xf32> to vector<8x32xbf16>
    %c0_25 = arith.constant 0 : index
    %c0_26 = arith.constant 0 : index
    %c0_27 = arith.constant 0 : index
    %43 = vector.load %arg11[%c0_25, %c0_26, %c0_27] : memref<1x8x32xbf16, #tpu.memory_space<vmem>>, vector<1x8x32xbf16>
    %44 = vector.shape_cast %43 : vector<1x8x32xbf16> to vector<8x32xbf16>
    %45 = vector.shape_cast %42 : vector<8x32xbf16> to vector<1x8x32xbf16>
    tpu.vector_store %arg11[%c0_25, %c0_26, %c0_27], %45 {strides = array<i32>} : memref<1x8x32xbf16, #tpu.memory_space<vmem>>, vector<1x8x32xbf16>,
    %46 = arith.truncf %36 : vector<8x32xf32> to vector<8x32xbf16>
    %c0_28 = arith.constant 0 : index
    %c0_29 = arith.constant 0 : index
    %c0_30 = arith.constant 0 : index
    %47 = vector.load %arg12[%c0_28, %c0_29, %c0_30] : memref<1x8x32xbf16, #tpu.memory_space<vmem>>, vector<1x8x32xbf16>
    %48 = vector.shape_cast %47 : vector<1x8x32xbf16> to vector<8x32xbf16>
    %49 = vector.shape_cast %46 : vector<8x32xbf16> to vector<1x8x32xbf16>
    tpu.vector_store %arg12[%c0_28, %c0_29, %c0_30], %49 {strides = array<i32>} : memref<1x8x32xbf16, #tpu.memory_space<vmem>>, vector<1x8x32xbf16>,
    %50 = arith.truncf %41 : vector<8x32xf32> to vector<8x32xbf16>
    %c0_31 = arith.constant 0 : index
    %c0_32 = arith.constant 0 : index
    %c0_33 = arith.constant 0 : index
    %51 = vector.load %arg13[%c0_31, %c0_32, %c0_33] : memref<1x8x32xbf16, #tpu.memory_space<vmem>>, vector<1x8x32xbf16>
    %52 = vector.shape_cast %51 : vector<1x8x32xbf16> to vector<8x32xbf16>
    %53 = vector.shape_cast %50 : vector<8x32xbf16> to vector<1x8x32xbf16>
    tpu.vector_store %arg13[%c0_31, %c0_32, %c0_33], %53 {strides = array<i32>} : memref<1x8x32xbf16, #tpu.memory_space<vmem>>, vector<1x8x32xbf16>,
    return
  }
  func.func @transform_0(%arg0: i32, %arg1: i32) -> (i32, i32, i32) {
    %c0_i32 = arith.constant 0 : i32
    %c0_i32_0 = arith.constant 0 : i32
    return %arg0, %arg1, %c0_i32 : i32, i32, i32
  }
  func.func @transform_1(%arg0: i32, %arg1: i32) -> (i32, i32) {
    %c0_i32 = arith.constant 0 : i32
    %c0_i32_0 = arith.constant 0 : i32
    %c0_i32_1 = arith.constant 0 : i32
    return %c0_i32, %c0_i32_0 : i32, i32
  }
  func.func @transform_2(%arg0: i32, %arg1: i32) -> (i32, i32) {
    %c0_i32 = arith.constant 0 : i32
    %c0_i32_0 = arith.constant 0 : i32
    %c0_i32_1 = arith.constant 0 : i32
    return %c0_i32, %c0_i32_0 : i32, i32
  }
  func.func @transform_3(%arg0: i32, %arg1: i32) -> (i32, i32) {
    %c0_i32 = arith.constant 0 : i32
    %c0_i32_0 = arith.constant 0 : i32
    %c0_i32_1 = arith.constant 0 : i32
    return %c0_i32, %c0_i32_0 : i32, i32
  }
  func.func @transform_4(%arg0: i32, %arg1: i32) -> (i32, i32) {
    %c0_i32 = arith.constant 0 : i32
    %c0_i32_0 = arith.constant 0 : i32
    %c0_i32_1 = arith.constant 0 : i32
    return %c0_i32, %c0_i32_0 : i32, i32
  }
  func.func @transform_5(%arg0: i32, %arg1: i32) -> (i32, i32) {
    %c0_i32 = arith.constant 0 : i32
    %c0_i32_0 = arith.constant 0 : i32
    %c0_i32_1 = arith.constant 0 : i32
    return %c0_i32, %c0_i32_0 : i32, i32
  }
  func.func @transform_6(%arg0: i32, %arg1: i32) -> (i32, i32) {
    %c0_i32 = arith.constant 0 : i32
    %c0_i32_0 = arith.constant 0 : i32
    %c0_i32_1 = arith.constant 0 : i32
    return %c0_i32, %c0_i32_0 : i32, i32
  }
  func.func @transform_7(%arg0: i32, %arg1: i32) -> (i32, i32) {
    %c0_i32 = arith.constant 0 : i32
    %c0_i32_0 = arith.constant 0 : i32
    %c0_i32_1 = arith.constant 0 : i32
    return %c0_i32, %c0_i32_0 : i32, i32
  }
  func.func @transform_8(%arg0: i32, %arg1: i32) -> (i32, i32) {
    %c0_i32 = arith.constant 0 : i32
    %c0_i32_0 = arith.constant 0 : i32
    %c0_i32_1 = arith.constant 0 : i32
    return %c0_i32, %c0_i32_0 : i32, i32
  }
  func.func @transform_9(%arg0: i32, %arg1: i32) -> (i32, i32, i32) {
    %c0_i32 = arith.constant 0 : i32
    %c0_i32_0 = arith.constant 0 : i32
    return %arg0, %arg1, %c0_i32 : i32, i32, i32
  }
  func.func @transform_10(%arg0: i32, %arg1: i32) -> (i32, i32, i32) {
    %c0_i32 = arith.constant 0 : i32
    %c0_i32_0 = arith.constant 0 : i32
    return %arg0, %arg1, %c0_i32 : i32, i32, i32
  }
  func.func @transform_11(%arg0: i32, %arg1: i32) -> (i32, i32, i32) {
    %c0_i32 = arith.constant 0 : i32
    %c0_i32_0 = arith.constant 0 : i32
    return %arg0, %arg1, %c0_i32 : i32, i32, i32
  }
}

</mosaic_0001>

<bundles_post_ra>
// kernel: tpu_custom_call.1
= control target key start
LH: loop header
LB: loop body
LE: loop exit
PB: predicated region body
PF: predicated region fallthrough
CT: control target
= control target key end

     0   :  { %s2243_s0 = inlined_call_operand.hbm [shape: f32[2,8,32], index: 0, kind: input, shape index: {}]   ;;  %s2244_s1 = inlined_call_operand.hbm [shape: f32[1,32], index: 1, kind: input, shape index: {}]   ;;  %s2245_s2 = inlined_call_operand.hbm [shape: f32[1,32], index: 2, kind: input, shape index: {}]   ;;  %s2246_s3 = inlined_call_operand.hbm [shape: bf16[32,32], index: 3, kind: input, shape index: {}]   ;;  %s2247_s4 = inlined_call_operand.hbm [shape: bf16[32,32], index: 4, kind: input, shape index: {}]   ;;  %s2248_s5 = inlined_call_operand.hbm [shape: bf16[32,32], index: 5, kind: input, shape index: {}]   ;;  %s2249_s6 = inlined_call_operand.hbm [shape: f32[1,32], index: 6, kind: input, shape index: {}]   ;;  %s2250_s7 = inlined_call_operand.hbm [shape: f32[1,32], index: 7, kind: input, shape index: {}]   ;;  %s2251_s8 = inlined_call_operand.hbm [shape: f32[1,32], index: 8, kind: input, shape index: {}]   ;;  %s2252_s9 = inlined_call_operand.hbm [shape: bf16[2,8,32], index: 9, kind: output, shape index: {0}]   ;;  %s2253_s10 = inlined_call_operand.hbm [shape: bf16[2,8,32], index: 10, kind: output, shape index: {1}]   ;;  %s2254_s11 = inlined_call_operand.hbm [shape: bf16[2,8,32], index: 11, kind: output, shape index: {2}]  }
   0x1   :  { %2262 = sst [smem:[#allocation29_spill]] %s2243_s0 }
   0x2   :  { %2263 = sst [smem:[#allocation30_spill]] %s2244_s1 }
   0x3   :  { %2264 = sst [smem:[#allocation31_spill]] %s2245_s2 }
   0x4   :  { %2265 = sst [smem:[#allocation32_spill]] %s2246_s3 }
   0x5   :  { %2266 = sst [smem:[#allocation33_spill]] %s2247_s4 }
   0x6   :  { %2267 = sst [smem:[#allocation34_spill]] %s2252_s9 }
   0x7   :  { %2268 = sst [smem:[#allocation35_spill]] %s2253_s10 }
   0x8   :  { %2269 = sst [smem:[#allocation36_spill]] %s2254_s11 }
   0x9   :  { %17 = vsyncpa [#allocation3], 0 }
   0xa   :  { %19 = vsyncpa [#allocation3 + $0x1], 0 }
   0xb   :  { %20 = vsyncpa [#allocation6], 0 }
   0xc   :  { %21 = vsyncpa [#allocation9], 0 }
   0xd   :  { %22 = vsyncpa [#allocation12], 0 }
   0xe   :  { %23 = vsyncpa [#allocation15], 0 }
   0xf   :  { %24 = vsyncpa [#allocation4], 0 }
  0x10   :  { %26 = vsyncpa [#allocation4 + $0x1], 0 }
  0x11   :  { %27 = vsyncpa [#allocation19], 0 }
  0x12   :  { %29 = vsyncpa [#allocation19 + $0x1], 0  ;;  %s1789_s17 = smov 0   ;;  %s1791_s18 = smov 0  }
  0x13   :  { %s1793_s19 = smov 0   ;;  %s1795_s20 = smov 0  }
  0x14   :  { %s1797_s21 = smov 0   ;;  %s1799_s22 = smov 0  }
  0x15 LB: > { %2270 = sst [smem:[#allocation28_spill]] %s1703_s20  ;;  %s1820_s23 = sadd.s32 4294967295, %s1711_s22   ;;  %s1711_s22 = sphi %s1799_s22, %s35_s22   ;;  %s1707_s21 = sphi %s1797_s21, %s2306_s21   ;;  %s1703_s20 = sphi %s1795_s20, %s2305_s20   ;;  %s1699_s19 = sphi %s1793_s19, %s2304_s19   ;;  %s1695_s18 = sphi %s1791_s18, %s2303_s18   ;;  %s1691_s17 = sphi %s1789_s17, %s2302_s17  }
  0x16   : > { %p1054_p0 = scmp.ge.s32.totalorder %s1711_s22, 1  ;;  %p2256_p1 = scmp.eq.s32.totalorder %s1820_s23, 0 }
  0x17   : > { %p332_p2 = scmp.lt.s32.totalorder %s1711_s22, 3  ;;  %s1713_s25 = smov [#allocation5]  }
  0x18   : > { %s345_s26 = sshll.u32 %s1713_s25, 4  ;;  %s1714_s27 = smov [#allocation8]   ;;  %s346_s26 = int_to_ptr.vmem [resolvable:$true] %s345_s26 }
  0x19   : > { %p1825_p3 = pnand %p1054_p0, %p332_p2  ;;  %s366_s28 = sshll.u32 %s1714_s27, 4  ;;  %s1838_s28 = int_to_ptr.vmem [resolvable:$true] %s366_s28 }
  0x1a   : > { %s1715_s30 = smov [#allocation11]   ;;  %s2273_s1 = sld [smem:[#allocation30_spill]] }
  0x1b   : > { %s2271_s24 = scalar_select %p1825_p3, 1, 0 }
  0x1c   : > { %p1174_p5 = pneg %p1825_p3  ;;  %s1840_s12 = sshll.u32 %s1715_s30, 4  ;;  %s393_s12 = int_to_ptr.vmem [resolvable:$true] %s1840_s12 }
  0x1e   : > { %p1834_p6 = pnand %p1174_p5, %p2256_p1 }
  0x20   : > { %s1299_s15 = scalar_lea.hbm %s2273_s1, 16  ;;  %p1850_p8 = pneg %p1834_p6 }
  0x21   : > { %p1300_p7 = scmp.ne.s32.totalorder %s2273_s1, %s1299_s15  ;;  %p1306_p11 = scmp.lt.u32.totalorder %s1299_s15, %s2273_s1 }
  0x23   : > { %p1302_p9 = pnand %p1850_p8, %p1300_p7 }
  0x25   : > { %p1303_p10 = pneg %p1302_p9 }
  0x27   : > { %p1308_p12 = pnand %p1306_p11, %p1303_p10 }
  0x29   : > { %1311 = shalt.err (!%p1308_p12)
}
  0x2a   : > { %s1312_s13 = scalar_lea.vmem %s346_s26, 16  ;;  %s1319_s14 = scalar_lea.vmem %s346_s26, 32 }
  0x2b   : > { %p1313_p13 = scmp.ne.s32.totalorder %s346_s26, %s1312_s13  ;;  %p1320_p5 = scmp.lt.s32.totalorder %s346_s26, %s346_s26 }
  0x2c   : > { %p1321_p4 = scmp.lt.s32.totalorder %s1319_s14, %s1312_s13 }
  0x2d   : > { %p1315_p0 = pnand %p1313_p13, %p1850_p8 }
  0x2e   : > { %p1322_p1 = por %p1321_p4, %p1320_p5 }
  0x2f   : > { %p1316_p2 = pneg %p1315_p0 }
  0x31   : > { %p1323_p3 = pnand %p1322_p1, %p1316_p2 }
  0x33   : > { %1326 = shalt.err (!%p1323_p3)
}
  0x34   : > { %1177 = dma.hbm_to_vmem [thread:$0]  (!%p1834_p6), %s2273_s1, 16, %s346_s26, [#allocation6]  }
  0x35   : > { %s2275_s3 = sld [smem:[#allocation32_spill]] }
  0x3b   : > { %s1327_s30 = scalar_lea.hbm %s2275_s3, 256 }
  0x3c   : > { %p1328_p7 = scmp.ne.s32.totalorder %s2275_s3, %s1327_s30  ;;  %p1334_p1 = scmp.lt.u32.totalorder %s1327_s30, %s2275_s3 }
  0x3e   : > { %p1330_p9 = pnand %p1328_p7, %p1850_p8 }
  0x40   : > { %p1331_p4 = pneg %p1330_p9 }
  0x42   : > { %p1336_p3 = pnand %p1334_p1, %p1331_p4 }
  0x44   : > { %1339 = shalt.err (!%p1336_p3)
}
  0x45   : > { %s1340_s26 = scalar_lea.vmem %s1838_s28, 256  ;;  %p1348_p13 = scmp.lt.s32.totalorder %s1838_s28, %s1838_s28 }
  0x46   : > { %p1341_p10 = scmp.ne.s32.totalorder %s1838_s28, %s1340_s26  ;;  %p1349_p0 = scmp.lt.s32.totalorder %s1340_s26, %s1340_s26 }
  0x48   : > { %p1343_p11 = pnand %p1341_p10, %p1850_p8  ;;  %p1350_p2 = por %p1349_p0, %p1348_p13 }
  0x4a   : > { %p1344_p12 = pneg %p1343_p11 }
  0x4c   : > { %p1351_p5 = pnand %p1350_p2, %p1344_p12 }
  0x4e   : > { %1354 = shalt.err (!%p1351_p5)
}
  0x4f   : > { %s1716_s9 = smov 64   ;;  %s1717_s10 = smov 4  }
  0x50   : > { %1183 = dma.hbm_to_vmem [thread:$0]  (!%p1834_p6), %s2275_s3, 256, %s1838_s28, [#allocation9], %s1716_s9, %s1716_s9, %s1717_s10  }
  0x51   : > { %s1355_s30 = scalar_lea.hbm %s2248_s5, 256 }
  0x52   : > { %p1356_p7 = scmp.ne.s32.totalorder %s2248_s5, %s1355_s30  ;;  %p1362_p1 = scmp.lt.u32.totalorder %s1355_s30, %s2248_s5 }
  0x54   : > { %p1358_p9 = pnand %p1356_p7, %p1850_p8 }
  0x56   : > { %p1359_p4 = pneg %p1358_p9 }
  0x58   : > { %p1364_p3 = pnand %p1362_p1, %p1359_p4 }
  0x5a   : > { %1367 = shalt.err (!%p1364_p3)
}
  0x5b   : > { %s1368_s16 = scalar_lea.vmem %s393_s12, 256  ;;  %p1376_p13 = scmp.lt.s32.totalorder %s393_s12, %s393_s12 }
  0x5c   : > { %p1369_p10 = scmp.ne.s32.totalorder %s393_s12, %s1368_s16  ;;  %p1377_p0 = scmp.lt.s32.totalorder %s1368_s16, %s1368_s16 }
  0x5e   : > { %p1371_p11 = pnand %p1369_p10, %p1850_p8  ;;  %p1378_p2 = por %p1377_p0, %p1376_p13 }
  0x60   : > { %p1372_p12 = pneg %p1371_p11 }
  0x62   : > { %p1379_p5 = pnand %p1378_p2, %p1372_p12 }
  0x64   : > { %1382 = shalt.err (!%p1379_p5)
}
  0x65   : > { %1189 = dma.hbm_to_vmem [thread:$0]  (!%p1834_p6), %s2248_s5, 256, %s393_s12, [#allocation12], %s1716_s9, %s1716_s9, %s1717_s10  }
  0x66   : > { %s1718_s25 = smov [#allocation14]   ;;  %s1719_s15 = smov [#allocation7]  }
  0x67   : > { %s417_s11 = sshll.u32 %s1718_s25, 4  ;;  %s356_s30 = sshll.u32 %s1719_s15, 4  ;;  %s418_s11 = int_to_ptr.vmem [resolvable:$true] %s417_s11  ;;  %s357_s30 = int_to_ptr.vmem [resolvable:$true] %s356_s30 }
  0x68   : > { %s1383_s26 = scalar_lea.hbm %s2250_s7, 16 }
  0x69   : > { %p1384_p7 = scmp.ne.s32.totalorder %s2250_s7, %s1383_s26  ;;  %p1390_p1 = scmp.lt.u32.totalorder %s1383_s26, %s2250_s7 }
  0x6b   : > { %p1386_p9 = pnand %p1384_p7, %p1850_p8 }
  0x6d   : > { %p1387_p4 = pneg %p1386_p9 }
  0x6f   : > { %p1392_p3 = pnand %p1390_p1, %p1387_p4 }
  0x71   : > { %1395 = shalt.err (!%p1392_p3)
}
  0x72   : > { %s1396_s12 = scalar_lea.vmem %s418_s11, 16  ;;  %s1403_s28 = scalar_lea.vmem %s418_s11, 32 }
  0x73   : > { %p1397_p10 = scmp.ne.s32.totalorder %s418_s11, %s1396_s12  ;;  %p1404_p13 = scmp.lt.s32.totalorder %s418_s11, %s418_s11 }
  0x74   : > { %p1405_p0 = scmp.lt.s32.totalorder %s1403_s28, %s1396_s12 }
  0x75   : > { %p1399_p11 = pnand %p1397_p10, %p1850_p8 }
  0x76   : > { %p1406_p2 = por %p1405_p0, %p1404_p13 }
  0x77   : > { %p1400_p12 = pneg %p1399_p11 }
  0x79   : > { %p1407_p5 = pnand %p1406_p2, %p1400_p12 }
  0x7b   : > { %1410 = shalt.err (!%p1407_p5)
}
  0x7c   : > { %1195 = dma.hbm_to_vmem [thread:$0]  (!%p1834_p6), %s2250_s7, 16, %s418_s11, [#allocation15]  }
  0x7d   : > { %s2276_s2 = sld [smem:[#allocation31_spill]] }
  0x83   : > { %s1411_s13 = scalar_lea.hbm %s2276_s2, 16 }
  0x84   : > { %p1412_p7 = scmp.ne.s32.totalorder %s2276_s2, %s1411_s13  ;;  %p1418_p1 = scmp.lt.u32.totalorder %s1411_s13, %s2276_s2 }
  0x86   : > { %p1414_p9 = pnand %p1412_p7, %p1850_p8 }
  0x88   : > { %p1415_p4 = pneg %p1414_p9 }
  0x8a   : > { %p1420_p3 = pnand %p1418_p1, %p1415_p4 }
  0x8c   : > { %1423 = shalt.err (!%p1420_p3)
}
  0x8d   : > { %s1424_s12 = scalar_lea.vmem %s357_s30, 16  ;;  %s1431_s11 = scalar_lea.vmem %s357_s30, 32 }
  0x8e   : > { %p1425_p10 = scmp.ne.s32.totalorder %s357_s30, %s1424_s12  ;;  %p1432_p13 = scmp.lt.s32.totalorder %s357_s30, %s357_s30 }
  0x8f   : > { %p1433_p0 = scmp.lt.s32.totalorder %s1431_s11, %s1424_s12 }
  0x90   : > { %p1427_p11 = pnand %p1425_p10, %p1850_p8 }
  0x91   : > { %p1434_p2 = por %p1433_p0, %p1432_p13 }
  0x92   : > { %p1428_p12 = pneg %p1427_p11 }
  0x94   : > { %p1435_p5 = pnand %p1434_p2, %p1428_p12 }
  0x96   : > { %1438 = shalt.err (!%p1435_p5)
}
  0x97   : > { %1180 = dma.hbm_to_vmem [thread:$0]  (!%p1834_p6), %s2276_s2, 16, %s357_s30, [#allocation6]  }
  0x98   : > { %s1720_s25 = smov [#allocation10]   ;;  %s1721_s15 = smov [#allocation13]  }
  0x99   : > { %s379_s20 = sshll.u32 %s1720_s25, 4  ;;  %s406_s13 = sshll.u32 %s1721_s15, 4  ;;  %s380_s20 = int_to_ptr.vmem [resolvable:$true] %s379_s20  ;;  %s407_s13 = int_to_ptr.vmem [resolvable:$true] %s406_s13 }
  0x9a   : > { %s2277_s4 = sld [smem:[#allocation33_spill]] }
  0xa0   : > { %s1439_s16 = scalar_lea.hbm %s2277_s4, 256 }
  0xa1   : > { %p1440_p7 = scmp.ne.s32.totalorder %s2277_s4, %s1439_s16  ;;  %p1446_p1 = scmp.lt.u32.totalorder %s1439_s16, %s2277_s4 }
  0xa3   : > { %p1442_p9 = pnand %p1440_p7, %p1850_p8 }
  0xa5   : > { %p1443_p4 = pneg %p1442_p9 }
  0xa7   : > { %p1448_p3 = pnand %p1446_p1, %p1443_p4 }
  0xa9   : > { %1451 = shalt.err (!%p1448_p3)
}
  0xaa   : > { %s1452_s30 = scalar_lea.vmem %s380_s20, 256  ;;  %p1460_p13 = scmp.lt.s32.totalorder %s380_s20, %s380_s20 }
  0xab   : > { %p1453_p10 = scmp.ne.s32.totalorder %s380_s20, %s1452_s30  ;;  %p1461_p0 = scmp.lt.s32.totalorder %s1452_s30, %s1452_s30 }
  0xad   : > { %p1455_p11 = pnand %p1453_p10, %p1850_p8  ;;  %p1462_p2 = por %p1461_p0, %p1460_p13 }
  0xaf   : > { %p1456_p12 = pneg %p1455_p11 }
  0xb1   : > { %p1463_p5 = pnand %p1462_p2, %p1456_p12 }
  0xb3   : > { %1466 = shalt.err (!%p1463_p5)
}
  0xb4   : > { %1186 = dma.hbm_to_vmem [thread:$0]  (!%p1834_p6), %s2277_s4, 256, %s380_s20, [#allocation9], %s1716_s9, %s1716_s9, %s1717_s10  }
  0xb5   : > { %s1467_s26 = scalar_lea.hbm %s2249_s6, 16 }
  0xb6   : > { %p1468_p7 = scmp.ne.s32.totalorder %s2249_s6, %s1467_s26  ;;  %p1474_p1 = scmp.lt.u32.totalorder %s1467_s26, %s2249_s6 }
  0xb8   : > { %p1470_p9 = pnand %p1468_p7, %p1850_p8 }
  0xba   : > { %p1471_p4 = pneg %p1470_p9 }
  0xbc   : > { %p1476_p3 = pnand %p1474_p1, %p1471_p4 }
  0xbe   : > { %1479 = shalt.err (!%p1476_p3)
}
  0xbf   : > { %s1480_s28 = scalar_lea.vmem %s407_s13, 16  ;;  %s1487_s9 = scalar_lea.vmem %s407_s13, 32 }
  0xc0   : > { %p1481_p10 = scmp.ne.s32.totalorder %s407_s13, %s1480_s28  ;;  %p1488_p13 = scmp.lt.s32.totalorder %s407_s13, %s407_s13 }
  0xc1   : > { %p1489_p0 = scmp.lt.s32.totalorder %s1487_s9, %s1480_s28 }
  0xc2   : > { %p1483_p11 = pnand %p1481_p10, %p1850_p8 }
  0xc3   : > { %p1490_p2 = por %p1489_p0, %p1488_p13 }
  0xc4   : > { %p1484_p12 = pneg %p1483_p11 }
  0xc6   : > { %p1491_p5 = pnand %p1490_p2, %p1484_p12 }
  0xc8   : > { %1494 = shalt.err (!%p1491_p5)
}
  0xc9   : > { %1192 = dma.hbm_to_vmem [thread:$0]  (!%p1834_p6), %s2249_s6, 16, %s407_s13, [#allocation12]  }
  0xca   : > { %s1722_s30 = smov [#allocation16]   ;;  %s1495_s14 = scalar_lea.hbm %s2251_s8, 16 }
  0xcb   : > { %s428_s3 = sshll.u32 %s1722_s30, 4  ;;  %p1496_p7 = scmp.ne.s32.totalorder %s2251_s8, %s1495_s14  ;;  %s429_s3 = int_to_ptr.vmem [resolvable:$true] %s428_s3 }
  0xcc   : > { %p1502_p1 = scmp.lt.u32.totalorder %s1495_s14, %s2251_s8 }
  0xcd   : > { %p1498_p9 = pnand %p1496_p7, %p1850_p8 }
  0xcf   : > { %p1499_p4 = pneg %p1498_p9 }
  0xd1   : > { %p1504_p3 = pnand %p1502_p1, %p1499_p4 }
  0xd3   : > { %1507 = shalt.err (!%p1504_p3)
}
  0xd4   : > { %s1508_s13 = scalar_lea.vmem %s429_s3, 16  ;;  %s1515_s11 = scalar_lea.vmem %s429_s3, 32 }
  0xd5   : > { %p1509_p10 = scmp.ne.s32.totalorder %s429_s3, %s1508_s13  ;;  %p1516_p13 = scmp.lt.s32.totalorder %s429_s3, %s429_s3 }
  0xd6   : > { %p1517_p0 = scmp.lt.s32.totalorder %s1515_s11, %s1508_s13 }
  0xd7   : > { %p1511_p11 = pnand %p1509_p10, %p1850_p8 }
  0xd8   : > { %p1518_p2 = por %p1517_p0, %p1516_p13 }
  0xd9   : > { %p1512_p12 = pneg %p1511_p11 }
  0xdb   : > { %p1519_p5 = pnand %p1518_p2, %p1512_p12 }
  0xdd   : > { %1522 = shalt.err (!%p1519_p5)
}
  0xde   : > { %1198 = dma.hbm_to_vmem [thread:$0]  (!%p1834_p6), %s2251_s8, 16, %s429_s3, [#allocation15]  }
  0xdf   : > { %s2260_s27 = sadd.s32 4294967294, %s1711_s22   ;;  %s47_s10 = sadd.s32 1, %s1707_s21 }
  0xe0   : > { %p49_p8 = scmp.ge.s32.totalorder %s47_s10, 2  ;;  %s56_s29 = sadd.s32 1, %s1699_s19 }
  0xe1   : > { %p63_p7 = scmp.ne.s32.totalorder %s1699_s19, %s1695_s18  ;;  %p64_p9 = scmp.eq.s32.totalorder %s1711_s22, 0 }
  0xe2   : > { %s2308_s10 = smov (%p49_p8, %s47_s10), 0  ;;  %p69_p1 = scmp.ne.s32.totalorder %s1695_s18, %s1691_s17 }
  0xe3   : > { %p2015_p4 = por %p64_p9, %p63_p7  ;;  %s51_s30 = ssub.s32 %s1707_s21, %s2308_s10 }
  0xe4   : > { %p263_p6 = scmp.eq.s32.totalorder %s1820_s23, 1  ;;  %p54_p3 = scmp.eq.s32.totalorder %s51_s30, 0 }
  0xe5   : > { %p2279_p10 = scmp.eq.s32.totalorder %s1820_s23, 0  ;;  %p269_p13 = scmp.eq.s32.totalorder %s2260_s27, 1 }
  0xe6   : > { %p2030_p12 = por %p263_p6, %p63_p7  ;;  %p1221_p2 = scmp.lt.s32.totalorder %s1711_s22, 2 }
  0xe7   : > { %p2026_p11 = por %p2279_p10, %p69_p1  ;;  %p2039_p0 = por %p269_p13, %p69_p1 }
  0xe8   : > { %s2281_s25 = scalar_select %p2030_p12, 1, 0 }
  0xe9   : > { %s2037_s15 = scalar_select %p54_p3, %s1699_s19, %s56_s29  }
  0xea   : > { %s2282_s14 = scalar_select %p2039_p0, 1, 0 }
  0xeb   : > { %s439_s26 = sand.u32 1, %s1699_s19   ;;  %s1065_s16 = sshll.u32 %s1707_s21, 7 }
  0xec   : > { %s1064_s1 = sshll.u32 %s439_s26, 3  ;;  %s2283_s0 = sld [smem:[#allocation29_spill]] }
  0xed   : > { %s443_s28 = scalar_lea.vmem [#allocation2], %s1064_s1  ;;  %p2053_p5 = pnand %p1221_p2, %p2015_p4 }
  0xee   : > { %s451_s9 = sshll.u32 %s443_s28, 4  ;;  %s440_s30 = scalar_lea.sflag [#allocation3], %s439_s26  ;;  %s2057_s9 = int_to_ptr.vmem [resolvable:$true] %s451_s9 }
  0xef   : > { %p1525_p7 = pneg %p2053_p5 }
  0xf2   : > { %s2049_s11 = scalar_lea.hbm %s2283_s0, %s1065_s16  ;;  %s1528_s20 = scalar_lea.hbm %s2283_s0, 256 }
  0xf3   : > { %s1523_s27 = scalar_lea.hbm %s2049_s11, 128  ;;  %p1529_p4 = scmp.lt.u32.totalorder %s2049_s11, %s2283_s0 }
  0xf4   : > { %p1524_p8 = scmp.ne.s32.totalorder %s2049_s11, %s1523_s27  ;;  %p1530_p6 = scmp.lt.u32.totalorder %s1528_s20, %s1523_s27 }
  0xf5   : > { %p1532_p10 = scmp.lt.u32.totalorder %s1523_s27, %s2049_s11 }
  0xf6   : > { %p1526_p9 = pnand %p1525_p7, %p1524_p8  ;;  %p1531_p3 = por %p1530_p6, %p1529_p4 }
  0xf8   : > { %p1527_p1 = pneg %p1526_p9  ;;  %p1533_p13 = por %p1532_p10, %p1531_p3 }
  0xfa   : > { %p1534_p2 = pnand %p1533_p13, %p1527_p1 }
  0xfc   : > { %1537 = shalt.err (!%p1534_p2)
}
  0xfd   : > { %s1538_s26 = scalar_lea.vmem %s2057_s9, 128  ;;  %s1723_s28 = smov [#allocation2]  }
  0xfe   : > { %p1539_p8 = scmp.ne.s32.totalorder %s2057_s9, %s1538_s26  ;;  %s1543_s16 = sshll.u32 %s1723_s28, 4  ;;  %s1544_s16 = int_to_ptr.vmem [resolvable:$false] %s1543_s16 }
  0xff   : > { %s1545_s1 = scalar_lea.vmem %s1544_s16, 256  ;;  %p1546_p12 = scmp.lt.s32.totalorder %s2057_s9, %s1544_s16 }
 0x100   : > { %p1541_p9 = pnand %p1539_p8, %p1525_p7  ;;  %p1547_p4 = scmp.lt.s32.totalorder %s1545_s1, %s1538_s26 }
 0x102   : > { %p1542_p0 = pneg %p1541_p9  ;;  %p1548_p6 = por %p1547_p4, %p1546_p12 }
 0x104   : > { %p1549_p3 = pnand %p1548_p6, %p1542_p0 }
 0x106   : > { %1552 = shalt.err (!%p1549_p3)
}
 0x107   : > { %1202 = dma.hbm_to_vmem [thread:$0]  (!%p2053_p5), %s2049_s11, 128, %s2057_s9, %s440_s30  }
 0x108   : > { %p2285_p1 = scmp.ne.s32.totalorder %s2271_s24, 0 }
 0x109   : > { %s2087_s27 = sand.u32 (!%p2285_p1), 1, %s1695_s18  }
 0x10a   : > { %460 = sbr.rel (%p2285_p1) target bundleno = 880 (0x370), region = 56  ;;  %s1067_s20 = sshll.u32 (!%p2285_p1), %s2087_s27, 3 }
 0x10b   : > { %s463_s12 = scalar_lea.sflag (!%p2285_p1), [#allocation3], %s2087_s27  ;;  %s466_s13 = scalar_lea.vmem (!%p2285_p1), [#allocation2], %s1067_s20 }
 0x111   : > { %1662 = dma.done.wait (%p2026_p11), %s463_s12, 128  }
 0x112   : > { %1664 = vsyncadd (%p2026_p11), %s463_s12, 4294967168  ;;  %p2286_p12 = scmp.eq.s32.totalorder %s1820_s23, 0 }
 0x114   : > { %1666 = dma.done.wait (%p2286_p12), [#allocation6], 32   ;;  %p2287_p0 = pmov %p2286_p12 }
 0x116   : > { %1668 = vsyncadd (%p2287_p0), [#allocation6], 4294967264  ;;  %p2288_p5 = pmov %p2287_p0 }
 0x117   : > { %p2289_p7 = pmov %p2287_p0 }
 0x118   : > { %1670 = dma.done.wait (%p2288_p5), [#allocation9], 512  }
 0x119   : > { %1672 = vsyncadd (%p2289_p7), [#allocation9], 4294966784  ;;  %p2290_p10 = pmov %p2287_p0 }
 0x11a   : > { %p2291_p13 = pmov %p2287_p0 }
 0x11b   : > { %1674 = dma.done.wait (%p2290_p10), [#allocation12], 272  }
 0x11c   : > { %1676 = vsyncadd (%p2291_p13), [#allocation12], 4294967024  ;;  %p2292_p11 = pmov %p2287_p0 }
 0x11d   : > { %p2293_p2 = pmov %p2287_p0 }
 0x11e   : > { %1678 = dma.done.wait (%p2292_p11), [#allocation15], 32  }
 0x11f   : > { %1680 = vsyncadd (%p2293_p2), [#allocation15], 4294967264  ;;  %vm551_vm0 = vcmask 261120   ;;  %v548_v0 = vld [vmem:[%s466_s13] sm:$0xff]  ;;  %v1291_v7 = vld [vmem:[#allocation8] sm:$0xff]   ;;  %v1724_v9 = vmov 0.0  }
 0x120   : > { %v552_v1 = vsel %vm551_vm0, %v548_v0, 0.0  ;;  %v1292_v8 = vld [vmem:[#allocation10] sm:$0xff]   ;;  %1110 = vmatprep.subr.bf16.mxu0 %v1724_v9  ;;  %1118 = vmatprep.subr.bf16.mxu1 %v1724_v9  ;;  %v1293_v10 = vld [vmem:[#allocation8 + $0x8] sm:$0xff]   ;;  %v1294_v11 = vld [vmem:[#allocation10 + $0x8] sm:$0xff]   ;;  %vm1725_vm1 = vmmov 0   ;;  %s2294_s24 = sld [smem:[#allocation28_spill]] }
 0x121   : > { %553 = vadd.xlane.f32.xlu0 %v552_v1  ;;  %1111 = vmatpush3.bf16.msra.mxu0 %v1291_v7  ;;  %v1079_v16 = vld [vmem:[#allocation5] ss:$0 sm:$0xff]  ;;  %v1080_v18 = vld [vmem:[#allocation7] ss:$0 sm:$0xff]  ;;  %v1295_v21 = vld [vmem:[#allocation11] sm:$0xff]   ;;  %s2120_s3 = sshll.u32 %s2087_s27, 2 }
 0x122   : > { %1119 = vmatpush3.bf16.msra.mxu1 %v1292_v8  ;;  %1112 = vmatprep.subr.bf16.mxu0 %v1724_v9  ;;  %v1296_v23 = vld [vmem:[#allocation11 + $0x8] sm:$0xff]   ;;  %v1081_v24 = vld [vmem:[#allocation13] ss:$0 sm:$0xff]  ;;  %v1085_v25 = vld [vmem:[#allocation14] ss:$0 sm:$0xff]  ;;  %s785_s11 = sand.u32 1, %s1820_s23  }
 0x123   : > { %1120 = vmatprep.subr.bf16.mxu1 %v1724_v9  ;;  %1114 = vmatprep.mubr.msk.bf16.mxu0 %vm1725_vm1, %v1724_v9  ;;  %s539_s29 = scalar_lea.vmem [#allocation18], %s2120_s3  ;;  %s532_s26 = scalar_lea.vmem [#allocation17], %s2120_s3  ;;  %vm774_vm2 = vcmask 257024   ;;  %v1089_v38 = vld [vmem:[#allocation16] ss:$0 sm:$0xff] }
 0x124   : > { %1122 = vmatprep.mubr.msk.bf16.mxu1 %vm1725_vm1, %v1724_v9  ;;  %s819_s30 = sshll.u32 %s539_s29, 4  ;;  %s805_s28 = sshll.u32 %s532_s26, 4  ;;  %s2134_s30 = int_to_ptr.vmem [resolvable:$true] %s819_s30  ;;  %s2142_s28 = int_to_ptr.vmem [resolvable:$true] %s805_s28 }
 0x125   : > { %1113 = vmatpush3.bf16.msra.mxu0 %v1293_v10  ;;  %s2295_s1 = sld [smem:[#allocation35_spill]]  ;;  %s2146_s16 = scalar_lea.sflag [#allocation19], %s785_s11 }
 0x126   : > { %1121 = vmatpush3.bf16.msra.mxu1 %v1294_v11  ;;  %1126 = vmatprep.subr.bf16.mxu0 %v1724_v9  ;;  %s2124_s9 = sshll.u32 %s2294_s24, 6  ;;  %s2296_s24 = sld [smem:[#allocation34_spill]] }
 0x127   : > { %s1553_s23 = scalar_lea.vmem %s2134_s30, 64  ;;  %p2297_p9 = scmp.ne.s32.totalorder %s2281_s25, 0 }
 0x128   : > { %p1554_p8 = scmp.ne.s32.totalorder %s2134_s30, %s1553_s23  ;;  %s1726_s12 = smov [#allocation18]  }
 0x129   : > { %s1557_s13 = sshll.u32 %s1726_s12, 4  ;;  %s1558_s13 = int_to_ptr.vmem [resolvable:$false] %s1557_s13 }
 0x12a   : > { %p1555_p4 = pnand %p1554_p8, %p2297_p9  ;;  %s1559_s2 = scalar_lea.vmem %s1558_s13, 128 }
 0x12b   : > { %s2132_s20 = scalar_lea.hbm %s2295_s1, %s2124_s9  ;;  %p1560_p3 = scmp.lt.s32.totalorder %s2134_s30, %s1558_s13 }
 0x12c   : > { %s2140_s0 = scalar_lea.hbm %s2296_s24, %s2124_s9  ;;  %p1556_p6 = pneg %p1555_p4 }
 0x12d   : > { %p1561_p1 = scmp.lt.s32.totalorder %s1559_s2, %s1553_s23 }
 0x12f   : > { %p1562_p12 = por %p1561_p1, %p1560_p3 }
 0x131   : > { %p1563_p0 = pnand %p1562_p12, %p1556_p6 }
 0x1ae   : > { %v554_v2 = vpop.xlane.xlu0 %553 }
 0x1af   : > { %v556_v3 = vmul.f32 0.03125, %v554_v2 }
 0x1b1   : > { %v557_v4 = vsub.f32 %v548_v0, %v556_v3 }
 0x1b3   : > { %v558_v5 = vmul.f32 %v557_v4, %v557_v4 }
 0x1b5   : > { %v559_v6 = vsel %vm551_vm0, %v558_v5, 0.0 }
 0x1b6   : > { %560 = vadd.xlane.f32.xlu0 %v559_v6 }
 0x243   : > { %v561_v12 = vpop.xlane.xlu0 %560 }
 0x244   : > { %v562_v13 = vmul.f32 0.03125, %v561_v12 }
 0x246   : > { %v563_v14 = vadd.f32 1e-05, %v562_v13 }
 0x248   : > { %1297 = vrsqrt.f32 %v563_v14 }
 0x252   : > { %v1298_v15 = vpop.eup %1297 }
 0x253   : > { %v565_v17 = vmul.f32 %v1298_v15, %v557_v4 }
 0x255   : > { %v572_v19 = vmul.f32 %v1079_v16, %v565_v17 }
 0x257   : > { %v579_v20 = vadd.f32 %v1080_v18, %v572_v19 }
 0x259   : > { %v580_v22 = vpack.c.bf16 %v579_v20, %v579_v20 }
 0x25b   : > { %1115 = vmatmul.mubr.msk.bf16.vlgmr.msra.gmra.mrb[0].mxu0 %vm551_vm0, %v580_v22  ;;  %1123 = vmatmul.mubr.msk.bf16.vlgmr.msra.gmra.mrb[0].mxu1 %vm551_vm0, %v580_v22 }
 0x25c   : > { %1127 = vmatpush3.bf16.msra.mxu0 %v1295_v21  ;;  %1130 = vmatprep.mubr.msk.bf16.mxu0 %vm1725_vm1, %v1724_v9 }
 0x25d   : > { %1128 = vmatprep.subr.bf16.mxu0 %v1724_v9 }
 0x260   : > { %1129 = vmatpush3.bf16.msra.mxu0 %v1296_v23 }
 0x263   : > { %1131 = vmatmul.mubr.msk.bf16.vlgmr.msra.gmra.mrb[4].mxu0 %vm551_vm0, %v580_v22 }
 0x32e   : > { %v641_v26 = vpop.f32.mrb[0].mxu0  ;;  %v704_v27 = vpop.f32.mrb[0].mxu1 }
 0x32f   : > { %v642_v28 = vadd.f32 %v1081_v24, %v641_v26  ;;  %v705_v29 = vadd.f32 %v1085_v25, %v704_v27  ;;  %v1116_v30 = vpop.f32.mrb[1].mxu0  ;;  %v1124_v31 = vpop.f32.mrb[1].mxu1 }
 0x330   : > { %v644_v32 = vpop.f32.mrb[2].mxu0  ;;  %v707_v33 = vpop.f32.mrb[2].mxu1 }
 0x331   : > { %v773_v34 = vpack.c.bf16 %v642_v28, %v642_v28  ;;  %v776_v35 = vpack.c.bf16 %v705_v29, %v705_v29  ;;  %v1117_v36 = vpop.f32.mrb[3].mxu0  ;;  %v1125_v37 = vpop.f32.mrb[3].mxu1 }
 0x333   : > { %777 = vst.msk [vmem:[%s539_s29] sm:$0xf] %vm774_vm2, %v776_v35  ;;  %775 = vst.msk [vmem:[%s532_s26] sm:$0xf] %vm774_vm2, %v773_v34 }
 0x334   : > { %1566 = shalt.err (!%p1563_p0)
}
 0x335   : > { %s1567_s11 = scalar_lea.hbm %s2132_s20, 64  ;;  %s1571_s12 = scalar_lea.hbm %s2295_s1, 128 }
 0x336   : > { %p1568_p5 = scmp.ne.s32.totalorder %s2132_s20, %s1567_s11  ;;  %p1572_p13 = scmp.lt.u32.totalorder %s2132_s20, %s2295_s1 }
 0x337   : > { %p1573_p11 = scmp.lt.u32.totalorder %s1571_s12, %s1567_s11  ;;  %p1575_p8 = scmp.lt.u32.totalorder %s1567_s11, %s2132_s20 }
 0x338   : > { %p1569_p7 = pnand %p1568_p5, %p2297_p9 }
 0x339   : > { %p1574_p2 = por %p1573_p11, %p1572_p13 }
 0x33a   : > { %p1570_p10 = pneg %p1569_p7 }
 0x33b   : > { %p1576_p4 = por %p1575_p8, %p1574_p2 }
 0x33d   : > { %p1577_p6 = pnand %p1576_p4, %p1570_p10 }
 0x33f   : > { %1580 = shalt.err (!%p1577_p6)
}
 0x340   : > { %1169 = dma.vmem_to_hbm [thread:$0]  (%p2297_p9), %s2134_s30, 64, %s2132_s20, %s2146_s16  }
 0x341   : > { %s781_s2 = scalar_lea.sflag [#allocation4], %s2087_s27  ;;  %s1581_s4 = scalar_lea.vmem %s2142_s28, 64 }
 0x342   : > { %p1582_p3 = scmp.ne.s32.totalorder %s2142_s28, %s1581_s4  ;;  %s1727_s23 = smov [#allocation17]  }
 0x343   : > { %s1585_s11 = sshll.u32 %s1727_s23, 4  ;;  %s1586_s11 = int_to_ptr.vmem [resolvable:$false] %s1585_s11 }
 0x344   : > { %p1583_p1 = pnand %p1582_p3, %p2297_p9  ;;  %s1587_s29 = scalar_lea.vmem %s1586_s11, 128 }
 0x345   : > { %p1588_p0 = scmp.lt.s32.totalorder %s2142_s28, %s1586_s11  ;;  %p1589_p5 = scmp.lt.s32.totalorder %s1587_s29, %s1581_s4 }
 0x346   : > { %p1584_p12 = pneg %p1583_p1 }
 0x347   : > { %p1590_p7 = por %p1589_p5, %p1588_p0 }
 0x349   : > { %p1591_p10 = pnand %p1590_p7, %p1584_p12 }
 0x34b   : > { %1594 = shalt.err (!%p1591_p10)
}
 0x34c   : > { %s1595_s27 = scalar_lea.hbm %s2140_s0, 64  ;;  %s1599_s26 = scalar_lea.hbm %s2296_s24, 128 }
 0x34d   : > { %p1596_p13 = scmp.ne.s32.totalorder %s2140_s0, %s1595_s27  ;;  %p1600_p8 = scmp.lt.u32.totalorder %s2140_s0, %s2296_s24 }
 0x34e   : > { %p1601_p4 = scmp.lt.u32.totalorder %s1599_s26, %s1595_s27  ;;  %p1603_p3 = scmp.lt.u32.totalorder %s1595_s27, %s2140_s0 }
 0x34f   : > { %p1597_p11 = pnand %p1596_p13, %p2297_p9 }
 0x350   : > { %p1602_p6 = por %p1601_p4, %p1600_p8 }
 0x351   : > { %p1598_p2 = pneg %p1597_p11 }
 0x352   : > { %p1604_p1 = por %p1603_p3, %p1602_p6 }
 0x354   : > { %p1605_p12 = pnand %p1604_p1, %p1598_p2 }
 0x356   : > { %1608 = shalt.err (!%p1605_p12)
}
 0x357   : > { %1168 = dma.vmem_to_hbm [thread:$0]  (%p2297_p9), %s2142_s28, 64, %s2140_s0, %s781_s2   ;;  %v767_v39 = vpop.f32.mrb[4].mxu0 }
 0x358   : > { %s546_s4 = scalar_lea.vmem [#allocation20], %s2120_s3  ;;  %v768_v40 = vadd.f32 %v1089_v38, %v767_v39  ;;  %v1132_v41 = vpop.f32.mrb[5].mxu0  ;;  %s2298_s27 = sld [smem:[#allocation36_spill]] }
 0x359   : > { %s833_s23 = sshll.u32 %s546_s4, 4  ;;  %v770_v42 = vpop.f32.mrb[6].mxu0  ;;  %s1728_s0 = smov [#allocation20]   ;;  %s834_s23 = int_to_ptr.vmem [resolvable:$true] %s833_s23 }
 0x35a   : > { %v778_v43 = vpack.c.bf16 %v768_v40, %v768_v40  ;;  %v1133_v44 = vpop.f32.mrb[7].mxu0  ;;  %s1609_s20 = scalar_lea.vmem %s834_s23, 64  ;;  %s1613_s3 = sshll.u32 %s1728_s0, 4  ;;  %s1614_s3 = int_to_ptr.vmem [resolvable:$false] %s1613_s3 }
 0x35b   : > { %p1610_p0 = scmp.ne.s32.totalorder %s834_s23, %s1609_s20  ;;  %s1615_s28 = scalar_lea.vmem %s1614_s3, 128 }
 0x35c   : > { %779 = vst.msk [vmem:[%s546_s4] sm:$0xf] %vm774_vm2, %v778_v43  ;;  %p1616_p10 = scmp.lt.s32.totalorder %s834_s23, %s1614_s3  ;;  %p1617_p13 = scmp.lt.s32.totalorder %s1615_s28, %s1609_s20 }
 0x35d   : > { %p1611_p5 = pnand %p1610_p0, %p2297_p9 }
 0x35e   : > { %s2197_s30 = scalar_lea.hbm %s2298_s27, %s2124_s9  ;;  %p1618_p11 = por %p1617_p13, %p1616_p10 }
 0x35f   : > { %p1612_p7 = pneg %p1611_p5 }
 0x361   : > { %p1619_p2 = pnand %p1618_p11, %p1612_p7 }
 0x363   : > { %1622 = shalt.err (!%p1619_p2)
}
 0x364   : > { %s1623_s9 = scalar_lea.hbm %s2197_s30, 64  ;;  %s1627_s12 = scalar_lea.hbm %s2298_s27, 128 }
 0x365   : > { %p1624_p8 = scmp.ne.s32.totalorder %s2197_s30, %s1623_s9  ;;  %p1628_p3 = scmp.lt.u32.totalorder %s2197_s30, %s2298_s27 }
 0x366   : > { %p1629_p1 = scmp.lt.u32.totalorder %s1627_s12, %s1623_s9  ;;  %p1631_p0 = scmp.lt.u32.totalorder %s1623_s9, %s2197_s30 }
 0x367   : > { %p1625_p4 = pnand %p1624_p8, %p2297_p9 }
 0x368   : > { %p1630_p12 = por %p1629_p1, %p1628_p3 }
 0x369   : > { %p1626_p6 = pneg %p1625_p4 }
 0x36a   : > { %p1632_p5 = por %p1631_p0, %p1630_p12 }
 0x36c   : > { %p1633_p7 = pnand %p1632_p5, %p1626_p6 }
 0x36e   : > { %1636 = shalt.err (!%p1633_p7)
}
 0x36f   : > { %1170 = dma.vmem_to_hbm [thread:$0]  (%p2297_p9), %s834_s23, 64, %s2197_s30, %s2146_s16  }
 0x370 PF: > { %s845_s11 = sand.u32 1, %s1691_s17   ;;  %p2299_p10 = scmp.ne.s32.totalorder %s2282_s14, 0 }
 0x371   : > { %p2300_p13 = scmp.ge.s32.totalorder %s1711_s22, 2  ;;  %s846_s29 = scalar_lea.sflag [#allocation4], %s845_s11 }
 0x373   : > { %p1204_p11 = pnand %p2300_p13, %p2299_p10 }
 0x375   : > { %1682 = dma.done.wait (!%p1204_p11), %s846_s29, 64  }
 0x376   : > { %1684 = vsyncadd (!%p1204_p11), %s846_s29, 4294967232  ;;  %s2301_s20 = sadd.s32 4294967294, %s1711_s22  }
 0x377   : > { %s854_s0 = sand.u32 1, %s2301_s20  }
 0x378   : > { %s855_s3 = scalar_lea.sflag [#allocation19], %s854_s0 }
 0x379   : > { %1686 = dma.done.wait (!%p1204_p11), %s855_s3, 128  }
 0x37a   : > { %1688 = vsyncadd (!%p1204_p11), %s855_s3, 4294967168  ;;  %s35_s22 = sadd.s32 1, %s1711_s22   ;;  %s2302_s17 = smov %s1695_s18 }
 0x37b   : > { %p32_p9 = scmp.ge.s32.totalorder %s35_s22, 4   ;;  %s2303_s18 = smov %s1699_s19 }
 0x37c   : > { %s2304_s19 = smov %s2037_s15  ;;  %s2305_s20 = smov %s1707_s21 }
 0x37d   : > { %s2306_s21 = smov %s2308_s10  ;;  %34 = sbr.rel (!%p32_p9) target bundleno = 21 (0x15), region = 165 }
 0x384   :  { %869 = vsyncpa [#allocation3], 1 }
 0x385   :  { %871 = vsyncpa [#allocation3 + $0x1], 1 }
 0x386   :  { %872 = vsyncpa [#allocation6], 1 }
 0x387   :  { %873 = vsyncpa [#allocation9], 1 }
 0x388   :  { %874 = vsyncpa [#allocation12], 1 }
 0x389   :  { %875 = vsyncpa [#allocation15], 1 }
 0x38a   :  { %876 = vsyncpa [#allocation4], 1 }
 0x38b   :  { %878 = vsyncpa [#allocation4 + $0x1], 1 }
 0x38c   :  { %879 = vsyncpa [#allocation19], 1 }
 0x38d   :  { %881 = vsyncpa [#allocation19 + $0x1], 1 }

// kernel: tpu_custom_call.1
= control target key start
LH: loop header
LB: loop body
LE: loop exit
PB: predicated region body
PF: predicated region fallthrough
CT: control target
= control target key end

     0   :  { %s2243_s0 = inlined_call_operand.hbm [shape: f32[2,8,32], index: 0, kind: input, shape index: {}]   ;;  %s2244_s1 = inlined_call_operand.hbm [shape: f32[1,32], index: 1, kind: input, shape index: {}]   ;;  %s2245_s2 = inlined_call_operand.hbm [shape: f32[1,32], index: 2, kind: input, shape index: {}]   ;;  %s2246_s3 = inlined_call_operand.hbm [shape: bf16[32,32], index: 3, kind: input, shape index: {}]   ;;  %s2247_s4 = inlined_call_operand.hbm [shape: bf16[32,32], index: 4, kind: input, shape index: {}]   ;;  %s2248_s5 = inlined_call_operand.hbm [shape: bf16[32,32], index: 5, kind: input, shape index: {}]   ;;  %s2249_s6 = inlined_call_operand.hbm [shape: f32[1,32], index: 6, kind: input, shape index: {}]   ;;  %s2250_s7 = inlined_call_operand.hbm [shape: f32[1,32], index: 7, kind: input, shape index: {}]   ;;  %s2251_s8 = inlined_call_operand.hbm [shape: f32[1,32], index: 8, kind: input, shape index: {}]   ;;  %s2252_s9 = inlined_call_operand.hbm [shape: bf16[2,8,32], index: 9, kind: output, shape index: {0}]   ;;  %s2253_s10 = inlined_call_operand.hbm [shape: bf16[2,8,32], index: 10, kind: output, shape index: {1}]   ;;  %s2254_s11 = inlined_call_operand.hbm [shape: bf16[2,8,32], index: 11, kind: output, shape index: {2}]  }
   0x1   :  { %2262 = sst [smem:[#allocation29_spill]] %s2243_s0 }
   0x2   :  { %2263 = sst [smem:[#allocation30_spill]] %s2244_s1 }
   0x3   :  { %2264 = sst [smem:[#allocation31_spill]] %s2245_s2 }
   0x4   :  { %2265 = sst [smem:[#allocation32_spill]] %s2246_s3 }
   0x5   :  { %2266 = sst [smem:[#allocation33_spill]] %s2247_s4 }
   0x6   :  { %2267 = sst [smem:[#allocation34_spill]] %s2252_s9 }
   0x7   :  { %2268 = sst [smem:[#allocation35_spill]] %s2253_s10 }
   0x8   :  { %2269 = sst [smem:[#allocation36_spill]] %s2254_s11 }
   0x9   :  { %17 = vsyncpa [#allocation3], 0 }
   0xa   :  { %19 = vsyncpa [#allocation3 + $0x1], 0 }
   0xb   :  { %20 = vsyncpa [#allocation6], 0 }
   0xc   :  { %21 = vsyncpa [#allocation9], 0 }
   0xd   :  { %22 = vsyncpa [#allocation12], 0 }
   0xe   :  { %23 = vsyncpa [#allocation15], 0 }
   0xf   :  { %24 = vsyncpa [#allocation4], 0 }
  0x10   :  { %26 = vsyncpa [#allocation4 + $0x1], 0 }
  0x11   :  { %27 = vsyncpa [#allocation19], 0 }
  0x12   :  { %29 = vsyncpa [#allocation19 + $0x1], 0  ;;  %s1789_s17 = smov 0   ;;  %s1791_s18 = smov 0  }
  0x13   :  { %s1793_s19 = smov 0   ;;  %s1795_s20 = smov 0  }
  0x14   :  { %s1797_s21 = smov 0   ;;  %s1799_s22 = smov 0  }
  0x15 LB: > { %2270 = sst [smem:[#allocation28_spill]] %s1703_s20  ;;  %s1820_s23 = sadd.s32 4294967295, %s1711_s22   ;;  %s1711_s22 = sphi %s1799_s22, %s35_s22   ;;  %s1707_s21 = sphi %s1797_s21, %s2306_s21   ;;  %s1703_s20 = sphi %s1795_s20, %s2305_s20   ;;  %s1699_s19 = sphi %s1793_s19, %s2304_s19   ;;  %s1695_s18 = sphi %s1791_s18, %s2303_s18   ;;  %s1691_s17 = sphi %s1789_s17, %s2302_s17  }
  0x16   : > { %p1054_p0 = scmp.ge.s32.totalorder %s1711_s22, 1  ;;  %p2256_p1 = scmp.eq.s32.totalorder %s1820_s23, 0 }
  0x17   : > { %p332_p2 = scmp.lt.s32.totalorder %s1711_s22, 3  ;;  %s1713_s25 = smov [#allocation5]  }
  0x18   : > { %s345_s26 = sshll.u32 %s1713_s25, 4  ;;  %s1714_s27 = smov [#allocation8]   ;;  %s346_s26 = int_to_ptr.vmem [resolvable:$true] %s345_s26 }
  0x19   : > { %p1825_p3 = pnand %p1054_p0, %p332_p2  ;;  %s366_s28 = sshll.u32 %s1714_s27, 4  ;;  %s1838_s28 = int_to_ptr.vmem [resolvable:$true] %s366_s28 }
  0x1a   : > { %s1715_s30 = smov [#allocation11]   ;;  %s2273_s1 = sld [smem:[#allocation30_spill]] }
  0x1b   : > { %s2271_s24 = scalar_select %p1825_p3, 1, 0 }
  0x1c   : > { %p1174_p5 = pneg %p1825_p3  ;;  %s1840_s12 = sshll.u32 %s1715_s30, 4  ;;  %s393_s12 = int_to_ptr.vmem [resolvable:$true] %s1840_s12 }
  0x1e   : > { %p1834_p6 = pnand %p1174_p5, %p2256_p1 }
  0x20   : > { %s1299_s15 = scalar_lea.hbm %s2273_s1, 16  ;;  %p1850_p8 = pneg %p1834_p6 }
  0x21   : > { %p1300_p7 = scmp.ne.s32.totalorder %s2273_s1, %s1299_s15  ;;  %p1306_p11 = scmp.lt.u32.totalorder %s1299_s15, %s2273_s1 }
  0x23   : > { %p1302_p9 = pnand %p1850_p8, %p1300_p7 }
  0x25   : > { %p1303_p10 = pneg %p1302_p9 }
  0x27   : > { %p1308_p12 = pnand %p1306_p11, %p1303_p10 }
  0x29   : > { %1311 = shalt.err (!%p1308_p12)
}
  0x2a   : > { %s1312_s13 = scalar_lea.vmem %s346_s26, 16  ;;  %s1319_s14 = scalar_lea.vmem %s346_s26, 32 }
  0x2b   : > { %p1313_p13 = scmp.ne.s32.totalorder %s346_s26, %s1312_s13  ;;  %p1320_p5 = scmp.lt.s32.totalorder %s346_s26, %s346_s26 }
  0x2c   : > { %p1321_p4 = scmp.lt.s32.totalorder %s1319_s14, %s1312_s13 }
  0x2d   : > { %p1315_p0 = pnand %p1313_p13, %p1850_p8 }
  0x2e   : > { %p1322_p1 = por %p1321_p4, %p1320_p5 }
  0x2f   : > { %p1316_p2 = pneg %p1315_p0 }
  0x31   : > { %p1323_p3 = pnand %p1322_p1, %p1316_p2 }
  0x33   : > { %1326 = shalt.err (!%p1323_p3)
}
  0x34   : > { %1177 = dma.hbm_to_vmem [thread:$0]  (!%p1834_p6), %s2273_s1, 16, %s346_s26, [#allocation6]  }
  0x35   : > { %s2275_s3 = sld [smem:[#allocation32_spill]] }
  0x3b   : > { %s1327_s30 = scalar_lea.hbm %s2275_s3, 256 }
  0x3c   : > { %p1328_p7 = scmp.ne.s32.totalorder %s2275_s3, %s1327_s30  ;;  %p1334_p1 = scmp.lt.u32.totalorder %s1327_s30, %s2275_s3 }
  0x3e   : > { %p1330_p9 = pnand %p1328_p7, %p1850_p8 }
  0x40   : > { %p1331_p4 = pneg %p1330_p9 }
  0x42   : > { %p1336_p3 = pnand %p1334_p1, %p1331_p4 }
  0x44   : > { %1339 = shalt.err (!%p1336_p3)
}
  0x45   : > { %s1340_s26 = scalar_lea.vmem %s1838_s28, 256  ;;  %p1348_p13 = scmp.lt.s32.totalorder %s1838_s28, %s1838_s28 }
  0x46   : > { %p1341_p10 = scmp.ne.s32.totalorder %s1838_s28, %s1340_s26  ;;  %p1349_p0 = scmp.lt.s32.totalorder %s1340_s26, %s1340_s26 }
  0x48   : > { %p1343_p11 = pnand %p1341_p10, %p1850_p8  ;;  %p1350_p2 = por %p1349_p0, %p1348_p13 }
  0x4a   : > { %p1344_p12 = pneg %p1343_p11 }
  0x4c   : > { %p1351_p5 = pnand %p1350_p2, %p1344_p12 }
  0x4e   : > { %1354 = shalt.err (!%p1351_p5)
}
  0x4f   : > { %s1716_s9 = smov 64   ;;  %s1717_s10 = smov 4  }
  0x50   : > { %1183 = dma.hbm_to_vmem [thread:$0]  (!%p1834_p6), %s2275_s3, 256, %s1838_s28, [#allocation9], %s1716_s9, %s1716_s9, %s1717_s10  }
  0x51   : > { %s1355_s30 = scalar_lea.hbm %s2248_s5, 256 }
  0x52   : > { %p1356_p7 = scmp.ne.s32.totalorder %s2248_s5, %s1355_s30  ;;  %p1362_p1 = scmp.lt.u32.totalorder %s1355_s30, %s2248_s5 }
  0x54   : > { %p1358_p9 = pnand %p1356_p7, %p1850_p8 }
  0x56   : > { %p1359_p4 = pneg %p1358_p9 }
  0x58   : > { %p1364_p3 = pnand %p1362_p1, %p1359_p4 }
  0x5a   : > { %1367 = shalt.err (!%p1364_p3)
}
  0x5b   : > { %s1368_s16 = scalar_lea.vmem %s393_s12, 256  ;;  %p1376_p13 = scmp.lt.s32.totalorder %s393_s12, %s393_s12 }
  0x5c   : > { %p1369_p10 = scmp.ne.s32.totalorder %s393_s12, %s1368_s16  ;;  %p1377_p0 = scmp.lt.s32.totalorder %s1368_s16, %s1368_s16 }
  0x5e   : > { %p1371_p11 = pnand %p1369_p10, %p1850_p8  ;;  %p1378_p2 = por %p1377_p0, %p1376_p13 }
  0x60   : > { %p1372_p12 = pneg %p1371_p11 }
  0x62   : > { %p1379_p5 = pnand %p1378_p2, %p1372_p12 }
  0x64   : > { %1382 = shalt.err (!%p1379_p5)
}
  0x65   : > { %1189 = dma.hbm_to_vmem [thread:$0]  (!%p1834_p6), %s2248_s5, 256, %s393_s12, [#allocation12], %s1716_s9, %s1716_s9, %s1717_s10  }
  0x66   : > { %s1718_s25 = smov [#allocation14]   ;;  %s1719_s15 = smov [#allocation7]  }
  0x67   : > { %s417_s11 = sshll.u32 %s1718_s25, 4  ;;  %s356_s30 = sshll.u32 %s1719_s15, 4  ;;  %s418_s11 = int_to_ptr.vmem [resolvable:$true] %s417_s11  ;;  %s357_s30 = int_to_ptr.vmem [resolvable:$true] %s356_s30 }
  0x68   : > { %s1383_s26 = scalar_lea.hbm %s2250_s7, 16 }
  0x69   : > { %p1384_p7 = scmp.ne.s32.totalorder %s2250_s7, %s1383_s26  ;;  %p1390_p1 = scmp.lt.u32.totalorder %s1383_s26, %s2250_s7 }
  0x6b   : > { %p1386_p9 = pnand %p1384_p7, %p1850_p8 }
  0x6d   : > { %p1387_p4 = pneg %p1386_p9 }
  0x6f   : > { %p1392_p3 = pnand %p1390_p1, %p1387_p4 }
  0x71   : > { %1395 = shalt.err (!%p1392_p3)
}
  0x72   : > { %s1396_s12 = scalar_lea.vmem %s418_s11, 16  ;;  %s1403_s28 = scalar_lea.vmem %s418_s11, 32 }
  0x73   : > { %p1397_p10 = scmp.ne.s32.totalorder %s418_s11, %s1396_s12  ;;  %p1404_p13 = scmp.lt.s32.totalorder %s418_s11, %s418_s11 }
  0x74   : > { %p1405_p0 = scmp.lt.s32.totalorder %s1403_s28, %s1396_s12 }
  0x75   : > { %p1399_p11 = pnand %p1397_p10, %p1850_p8 }
  0x76   : > { %p1406_p2 = por %p1405_p0, %p1404_p13 }
  0x77   : > { %p1400_p12 = pneg %p1399_p11 }
  0x79   : > { %p1407_p5 = pnand %p1406_p2, %p1400_p12 }
  0x7b   : > { %1410 = shalt.err (!%p1407_p5)
}
  0x7c   : > { %1195 = dma.hbm_to_vmem [thread:$0]  (!%p1834_p6), %s2250_s7, 16, %s418_s11, [#allocation15]  }
  0x7d   : > { %s2276_s2 = sld [smem:[#allocation31_spill]] }
  0x83   : > { %s1411_s13 = scalar_lea.hbm %s2276_s2, 16 }
  0x84   : > { %p1412_p7 = scmp.ne.s32.totalorder %s2276_s2, %s1411_s13  ;;  %p1418_p1 = scmp.lt.u32.totalorder %s1411_s13, %s2276_s2 }
  0x86   : > { %p1414_p9 = pnand %p1412_p7, %p1850_p8 }
  0x88   : > { %p1415_p4 = pneg %p1414_p9 }
  0x8a   : > { %p1420_p3 = pnand %p1418_p1, %p1415_p4 }
  0x8c   : > { %1423 = shalt.err (!%p1420_p3)
}
  0x8d   : > { %s1424_s12 = scalar_lea.vmem %s357_s30, 16  ;;  %s1431_s11 = scalar_lea.vmem %s357_s30, 32 }
  0x8e   : > { %p1425_p10 = scmp.ne.s32.totalorder %s357_s30, %s1424_s12  ;;  %p1432_p13 = scmp.lt.s32.totalorder %s357_s30, %s357_s30 }
  0x8f   : > { %p1433_p0 = scmp.lt.s32.totalorder %s1431_s11, %s1424_s12 }
  0x90   : > { %p1427_p11 = pnand %p1425_p10, %p1850_p8 }
  0x91   : > { %p1434_p2 = por %p1433_p0, %p1432_p13 }
  0x92   : > { %p1428_p12 = pneg %p1427_p11 }
  0x94   : > { %p1435_p5 = pnand %p1434_p2, %p1428_p12 }
  0x96   : > { %1438 = shalt.err (!%p1435_p5)
}
  0x97   : > { %1180 = dma.hbm_to_vmem [thread:$0]  (!%p1834_p6), %s2276_s2, 16, %s357_s30, [#allocation6]  }
  0x98   : > { %s1720_s25 = smov [#allocation10]   ;;  %s1721_s15 = smov [#allocation13]  }
  0x99   : > { %s379_s20 = sshll.u32 %s1720_s25, 4  ;;  %s406_s13 = sshll.u32 %s1721_s15, 4  ;;  %s380_s20 = int_to_ptr.vmem [resolvable:$true] %s379_s20  ;;  %s407_s13 = int_to_ptr.vmem [resolvable:$true] %s406_s13 }
  0x9a   : > { %s2277_s4 = sld [smem:[#allocation33_spill]] }
  0xa0   : > { %s1439_s16 = scalar_lea.hbm %s2277_s4, 256 }
  0xa1   : > { %p1440_p7 = scmp.ne.s32.totalorder %s2277_s4, %s1439_s16  ;;  %p1446_p1 = scmp.lt.u32.totalorder %s1439_s16, %s2277_s4 }
  0xa3   : > { %p1442_p9 = pnand %p1440_p7, %p1850_p8 }
  0xa5   : > { %p1443_p4 = pneg %p1442_p9 }
  0xa7   : > { %p1448_p3 = pnand %p1446_p1, %p1443_p4 }
  0xa9   : > { %1451 = shalt.err (!%p1448_p3)
}
  0xaa   : > { %s1452_s30 = scalar_lea.vmem %s380_s20, 256  ;;  %p1460_p13 = scmp.lt.s32.totalorder %s380_s20, %s380_s20 }
  0xab   : > { %p1453_p10 = scmp.ne.s32.totalorder %s380_s20, %s1452_s30  ;;  %p1461_p0 = scmp.lt.s32.totalorder %s1452_s30, %s1452_s30 }
  0xad   : > { %p1455_p11 = pnand %p1453_p10, %p1850_p8  ;;  %p1462_p2 = por %p1461_p0, %p1460_p13 }
  0xaf   : > { %p1456_p12 = pneg %p1455_p11 }
  0xb1   : > { %p1463_p5 = pnand %p1462_p2, %p1456_p12 }
  0xb3   : > { %1466 = shalt.err (!%p1463_p5)
}
  0xb4   : > { %1186 = dma.hbm_to_vmem [thread:$0]  (!%p1834_p6), %s2277_s4, 256, %s380_s20, [#allocation9], %s1716_s9, %s1716_s9, %s1717_s10  }
  0xb5   : > { %s1467_s26 = scalar_lea.hbm %s2249_s6, 16 }
  0xb6   : > { %p1468_p7 = scmp.ne.s32.totalorder %s2249_s6, %s1467_s26  ;;  %p1474_p1 = scmp.lt.u32.totalorder %s1467_s26, %s2249_s6 }
  0xb8   : > { %p1470_p9 = pnand %p1468_p7, %p1850_p8 }
  0xba   : > { %p1471_p4 = pneg %p1470_p9 }
  0xbc   : > { %p1476_p3 = pnand %p1474_p1, %p1471_p4 }
  0xbe   : > { %1479 = shalt.err (!%p1476_p3)
}
  0xbf   : > { %s1480_s28 = scalar_lea.vmem %s407_s13, 16  ;;  %s1487_s9 = scalar_lea.vmem %s407_s13, 32 }
  0xc0   : > { %p1481_p10 = scmp.ne.s32.totalorder %s407_s13, %s1480_s28  ;;  %p1488_p13 = scmp.lt.s32.totalorder %s407_s13, %s407_s13 }
  0xc1   : > { %p1489_p0 = scmp.lt.s32.totalorder %s1487_s9, %s1480_s28 }
  0xc2   : > { %p1483_p11 = pnand %p1481_p10, %p1850_p8 }
  0xc3   : > { %p1490_p2 = por %p1489_p0, %p1488_p13 }
  0xc4   : > { %p1484_p12 = pneg %p1483_p11 }
  0xc6   : > { %p1491_p5 = pnand %p1490_p2, %p1484_p12 }
  0xc8   : > { %1494 = shalt.err (!%p1491_p5)
}
  0xc9   : > { %1192 = dma.hbm_to_vmem [thread:$0]  (!%p1834_p6), %s2249_s6, 16, %s407_s13, [#allocation12]  }
  0xca   : > { %s1722_s30 = smov [#allocation16]   ;;  %s1495_s14 = scalar_lea.hbm %s2251_s8, 16 }
  0xcb   : > { %s428_s3 = sshll.u32 %s1722_s30, 4  ;;  %p1496_p7 = scmp.ne.s32.totalorder %s2251_s8, %s1495_s14  ;;  %s429_s3 = int_to_ptr.vmem [resolvable:$true] %s428_s3 }
  0xcc   : > { %p1502_p1 = scmp.lt.u32.totalorder %s1495_s14, %s2251_s8 }
  0xcd   : > { %p1498_p9 = pnand %p1496_p7, %p1850_p8 }
  0xcf   : > { %p1499_p4 = pneg %p1498_p9 }
  0xd1   : > { %p1504_p3 = pnand %p1502_p1, %p1499_p4 }
  0xd3   : > { %1507 = shalt.err (!%p1504_p3)
}
  0xd4   : > { %s1508_s13 = scalar_lea.vmem %s429_s3, 16  ;;  %s1515_s11 = scalar_lea.vmem %s429_s3, 32 }
  0xd5   : > { %p1509_p10 = scmp.ne.s32.totalorder %s429_s3, %s1508_s13  ;;  %p1516_p13 = scmp.lt.s32.totalorder %s429_s3, %s429_s3 }
  0xd6   : > { %p1517_p0 = scmp.lt.s32.totalorder %s1515_s11, %s1508_s13 }
  0xd7   : > { %p1511_p11 = pnand %p1509_p10, %p1850_p8 }
  0xd8   : > { %p1518_p2 = por %p1517_p0, %p1516_p13 }
  0xd9   : > { %p1512_p12 = pneg %p1511_p11 }
  0xdb   : > { %p1519_p5 = pnand %p1518_p2, %p1512_p12 }
  0xdd   : > { %1522 = shalt.err (!%p1519_p5)
}
  0xde   : > { %1198 = dma.hbm_to_vmem [thread:$0]  (!%p1834_p6), %s2251_s8, 16, %s429_s3, [#allocation15]  }
  0xdf   : > { %s2260_s27 = sadd.s32 4294967294, %s1711_s22   ;;  %s47_s10 = sadd.s32 1, %s1707_s21 }
  0xe0   : > { %p49_p8 = scmp.ge.s32.totalorder %s47_s10, 2  ;;  %s56_s29 = sadd.s32 1, %s1699_s19 }
  0xe1   : > { %p63_p7 = scmp.ne.s32.totalorder %s1699_s19, %s1695_s18  ;;  %p64_p9 = scmp.eq.s32.totalorder %s1711_s22, 0 }
  0xe2   : > { %s2308_s10 = smov (%p49_p8, %s47_s10), 0  ;;  %p69_p1 = scmp.ne.s32.totalorder %s1695_s18, %s1691_s17 }
  0xe3   : > { %p2015_p4 = por %p64_p9, %p63_p7  ;;  %s51_s30 = ssub.s32 %s1707_s21, %s2308_s10 }
  0xe4   : > { %p263_p6 = scmp.eq.s32.totalorder %s1820_s23, 1  ;;  %p54_p3 = scmp.eq.s32.totalorder %s51_s30, 0 }
  0xe5   : > { %p2279_p10 = scmp.eq.s32.totalorder %s1820_s23, 0  ;;  %p269_p13 = scmp.eq.s32.totalorder %s2260_s27, 1 }
  0xe6   : > { %p2030_p12 = por %p263_p6, %p63_p7  ;;  %p1221_p2 = scmp.lt.s32.totalorder %s1711_s22, 2 }
  0xe7   : > { %p2026_p11 = por %p2279_p10, %p69_p1  ;;  %p2039_p0 = por %p269_p13, %p69_p1 }
  0xe8   : > { %s2281_s25 = scalar_select %p2030_p12, 1, 0 }
  0xe9   : > { %s2037_s15 = scalar_select %p54_p3, %s1699_s19, %s56_s29  }
  0xea   : > { %s2282_s14 = scalar_select %p2039_p0, 1, 0 }
  0xeb   : > { %s439_s26 = sand.u32 1, %s1699_s19   ;;  %s1065_s16 = sshll.u32 %s1707_s21, 7 }
  0xec   : > { %s1064_s1 = sshll.u32 %s439_s26, 3  ;;  %s2283_s0 = sld [smem:[#allocation29_spill]] }
  0xed   : > { %s443_s28 = scalar_lea.vmem [#allocation2], %s1064_s1  ;;  %p2053_p5 = pnand %p1221_p2, %p2015_p4 }
  0xee   : > { %s451_s9 = sshll.u32 %s443_s28, 4  ;;  %s440_s30 = scalar_lea.sflag [#allocation3], %s439_s26  ;;  %s2057_s9 = int_to_ptr.vmem [resolvable:$true] %s451_s9 }
  0xef   : > { %p1525_p7 = pneg %p2053_p5 }
  0xf2   : > { %s2049_s11 = scalar_lea.hbm %s2283_s0, %s1065_s16  ;;  %s1528_s20 = scalar_lea.hbm %s2283_s0, 256 }
  0xf3   : > { %s1523_s27 = scalar_lea.hbm %s2049_s11, 128  ;;  %p1529_p4 = scmp.lt.u32.totalorder %s2049_s11, %s2283_s0 }
  0xf4   : > { %p1524_p8 = scmp.ne.s32.totalorder %s2049_s11, %s1523_s27  ;;  %p1530_p6 = scmp.lt.u32.totalorder %s1528_s20, %s1523_s27 }
  0xf5   : > { %p1532_p10 = scmp.lt.u32.totalorder %s1523_s27, %s2049_s11 }
  0xf6   : > { %p1526_p9 = pnand %p1525_p7, %p1524_p8  ;;  %p1531_p3 = por %p1530_p6, %p1529_p4 }
  0xf8   : > { %p1527_p1 = pneg %p1526_p9  ;;  %p1533_p13 = por %p1532_p10, %p1531_p3 }
  0xfa   : > { %p1534_p2 = pnand %p1533_p13, %p1527_p1 }
  0xfc   : > { %1537 = shalt.err (!%p1534_p2)
}
  0xfd   : > { %s1538_s26 = scalar_lea.vmem %s2057_s9, 128  ;;  %s1723_s28 = smov [#allocation2]  }
  0xfe   : > { %p1539_p8 = scmp.ne.s32.totalorder %s2057_s9, %s1538_s26  ;;  %s1543_s16 = sshll.u32 %s1723_s28, 4  ;;  %s1544_s16 = int_to_ptr.vmem [resolvable:$false] %s1543_s16 }
  0xff   : > { %s1545_s1 = scalar_lea.vmem %s1544_s16, 256  ;;  %p1546_p12 = scmp.lt.s32.totalorder %s2057_s9, %s1544_s16 }
 0x100   : > { %p1541_p9 = pnand %p1539_p8, %p1525_p7  ;;  %p1547_p4 = scmp.lt.s32.totalorder %s1545_s1, %s1538_s26 }
 0x102   : > { %p1542_p0 = pneg %p1541_p9  ;;  %p1548_p6 = por %p1547_p4, %p1546_p12 }
 0x104   : > { %p1549_p3 = pnand %p1548_p6, %p1542_p0 }
 0x106   : > { %1552 = shalt.err (!%p1549_p3)
}
 0x107   : > { %1202 = dma.hbm_to_vmem [thread:$0]  (!%p2053_p5), %s2049_s11, 128, %s2057_s9, %s440_s30  }
 0x108   : > { %p2285_p1 = scmp.ne.s32.totalorder %s2271_s24, 0 }
 0x109   : > { %s2087_s27 = sand.u32 (!%p2285_p1), 1, %s1695_s18  }
 0x10a   : > { %460 = sbr.rel (%p2285_p1) target bundleno = 880 (0x370), region = 56  ;;  %s1067_s20 = sshll.u32 (!%p2285_p1), %s2087_s27, 3 }
 0x10b   : > { %s463_s12 = scalar_lea.sflag (!%p2285_p1), [#allocation3], %s2087_s27  ;;  %s466_s13 = scalar_lea.vmem (!%p2285_p1), [#allocation2], %s1067_s20 }
 0x111   : > { %1662 = dma.done.wait (%p2026_p11), %s463_s12, 128  }
 0x112   : > { %1664 = vsyncadd (%p2026_p11), %s463_s12, 4294967168  ;;  %p2286_p12 = scmp.eq.s32.totalorder %s1820_s23, 0 }
 0x114   : > { %1666 = dma.done.wait (%p2286_p12), [#allocation6], 32   ;;  %p2287_p0 = pmov %p2286_p12 }
 0x116   : > { %1668 = vsyncadd (%p2287_p0), [#allocation6], 4294967264  ;;  %p2288_p5 = pmov %p2287_p0 }
 0x117   : > { %p2289_p7 = pmov %p2287_p0 }
 0x118   : > { %1670 = dma.done.wait (%p2288_p5), [#allocation9], 512  }
 0x119   : > { %1672 = vsyncadd (%p2289_p7), [#allocation9], 4294966784  ;;  %p2290_p10 = pmov %p2287_p0 }
 0x11a   : > { %p2291_p13 = pmov %p2287_p0 }
 0x11b   : > { %1674 = dma.done.wait (%p2290_p10), [#allocation12], 272  }
 0x11c   : > { %1676 = vsyncadd (%p2291_p13), [#allocation12], 4294967024  ;;  %p2292_p11 = pmov %p2287_p0 }
 0x11d   : > { %p2293_p2 = pmov %p2287_p0 }
 0x11e   : > { %1678 = dma.done.wait (%p2292_p11), [#allocation15], 32  }
 0x11f   : > { %1680 = vsyncadd (%p2293_p2), [#allocation15], 4294967264  ;;  %vm551_vm0 = vcmask 261120   ;;  %v548_v0 = vld [vmem:[%s466_s13] sm:$0xff]  ;;  %v1291_v7 = vld [vmem:[#allocation8] sm:$0xff]   ;;  %v1724_v9 = vmov 0.0  }
 0x120   : > { %v552_v1 = vsel %vm551_vm0, %v548_v0, 0.0  ;;  %v1292_v8 = vld [vmem:[#allocation10] sm:$0xff]   ;;  %1110 = vmatprep.subr.bf16.mxu0 %v1724_v9  ;;  %1118 = vmatprep.subr.bf16.mxu1 %v1724_v9  ;;  %v1293_v10 = vld [vmem:[#allocation8 + $0x8] sm:$0xff]   ;;  %v1294_v11 = vld [vmem:[#allocation10 + $0x8] sm:$0xff]   ;;  %vm1725_vm1 = vmmov 0   ;;  %s2294_s24 = sld [smem:[#allocation28_spill]] }
 0x121   : > { %553 = vadd.xlane.f32.xlu0 %v552_v1  ;;  %1111 = vmatpush3.bf16.msra.mxu0 %v1291_v7  ;;  %v1079_v16 = vld [vmem:[#allocation5] ss:$0 sm:$0xff]  ;;  %v1080_v18 = vld [vmem:[#allocation7] ss:$0 sm:$0xff]  ;;  %v1295_v21 = vld [vmem:[#allocation11] sm:$0xff]   ;;  %s2120_s3 = sshll.u32 %s2087_s27, 2 }
 0x122   : > { %1119 = vmatpush3.bf16.msra.mxu1 %v1292_v8  ;;  %1112 = vmatprep.subr.bf16.mxu0 %v1724_v9  ;;  %v1296_v23 = vld [vmem:[#allocation11 + $0x8] sm:$0xff]   ;;  %v1081_v24 = vld [vmem:[#allocation13] ss:$0 sm:$0xff]  ;;  %v1085_v25 = vld [vmem:[#allocation14] ss:$0 sm:$0xff]  ;;  %s785_s11 = sand.u32 1, %s1820_s23  }
 0x123   : > { %1120 = vmatprep.subr.bf16.mxu1 %v1724_v9  ;;  %1114 = vmatprep.mubr.msk.bf16.mxu0 %vm1725_vm1, %v1724_v9  ;;  %s539_s29 = scalar_lea.vmem [#allocation18], %s2120_s3  ;;  %s532_s26 = scalar_lea.vmem [#allocation17], %s2120_s3  ;;  %vm774_vm2 = vcmask 257024   ;;  %v1089_v38 = vld [vmem:[#allocation16] ss:$0 sm:$0xff] }
 0x124   : > { %1122 = vmatprep.mubr.msk.bf16.mxu1 %vm1725_vm1, %v1724_v9  ;;  %s819_s30 = sshll.u32 %s539_s29, 4  ;;  %s805_s28 = sshll.u32 %s532_s26, 4  ;;  %s2134_s30 = int_to_ptr.vmem [resolvable:$true] %s819_s30  ;;  %s2142_s28 = int_to_ptr.vmem [resolvable:$true] %s805_s28 }
 0x125   : > { %1113 = vmatpush3.bf16.msra.mxu0 %v1293_v10  ;;  %s2295_s1 = sld [smem:[#allocation35_spill]]  ;;  %s2146_s16 = scalar_lea.sflag [#allocation19], %s785_s11 }
 0x126   : > { %1121 = vmatpush3.bf16.msra.mxu1 %v1294_v11  ;;  %1126 = vmatprep.subr.bf16.mxu0 %v1724_v9  ;;  %s2124_s9 = sshll.u32 %s2294_s24, 6  ;;  %s2296_s24 = sld [smem:[#allocation34_spill]] }
 0x127   : > { %s1553_s23 = scalar_lea.vmem %s2134_s30, 64  ;;  %p2297_p9 = scmp.ne.s32.totalorder %s2281_s25, 0 }
 0x128   : > { %p1554_p8 = scmp.ne.s32.totalorder %s2134_s30, %s1553_s23  ;;  %s1726_s12 = smov [#allocation18]  }
 0x129   : > { %s1557_s13 = sshll.u32 %s1726_s12, 4  ;;  %s1558_s13 = int_to_ptr.vmem [resolvable:$false] %s1557_s13 }
 0x12a   : > { %p1555_p4 = pnand %p1554_p8, %p2297_p9  ;;  %s1559_s2 = scalar_lea.vmem %s1558_s13, 128 }
 0x12b   : > { %s2132_s20 = scalar_lea.hbm %s2295_s1, %s2124_s9  ;;  %p1560_p3 = scmp.lt.s32.totalorder %s2134_s30, %s1558_s13 }
 0x12c   : > { %s2140_s0 = scalar_lea.hbm %s2296_s24, %s2124_s9  ;;  %p1556_p6 = pneg %p1555_p4 }
 0x12d   : > { %p1561_p1 = scmp.lt.s32.totalorder %s1559_s2, %s1553_s23 }
 0x12f   : > { %p1562_p12 = por %p1561_p1, %p1560_p3 }
 0x131   : > { %p1563_p0 = pnand %p1562_p12, %p1556_p6 }
 0x1ae   : > { %v554_v2 = vpop.xlane.xlu0 %553 }
 0x1af   : > { %v556_v3 = vmul.f32 0.03125, %v554_v2 }
 0x1b1   : > { %v557_v4 = vsub.f32 %v548_v0, %v556_v3 }
 0x1b3   : > { %v558_v5 = vmul.f32 %v557_v4, %v557_v4 }
 0x1b5   : > { %v559_v6 = vsel %vm551_vm0, %v558_v5, 0.0 }
 0x1b6   : > { %560 = vadd.xlane.f32.xlu0 %v559_v6 }
 0x243   : > { %v561_v12 = vpop.xlane.xlu0 %560 }
 0x244   : > { %v562_v13 = vmul.f32 0.03125, %v561_v12 }
 0x246   : > { %v563_v14 = vadd.f32 1e-05, %v562_v13 }
 0x248   : > { %1297 = vrsqrt.f32 %v563_v14 }
 0x252   : > { %v1298_v15 = vpop.eup %1297 }
 0x253   : > { %v565_v17 = vmul.f32 %v1298_v15, %v557_v4 }
 0x255   : > { %v572_v19 = vmul.f32 %v1079_v16, %v565_v17 }
 0x257   : > { %v579_v20 = vadd.f32 %v1080_v18, %v572_v19 }
 0x259   : > { %v580_v22 = vpack.c.bf16 %v579_v20, %v579_v20 }
 0x25b   : > { %1115 = vmatmul.mubr.msk.bf16.vlgmr.msra.gmra.mrb[0].mxu0 %vm551_vm0, %v580_v22  ;;  %1123 = vmatmul.mubr.msk.bf16.vlgmr.msra.gmra.mrb[0].mxu1 %vm551_vm0, %v580_v22 }
 0x25c   : > { %1127 = vmatpush3.bf16.msra.mxu0 %v1295_v21  ;;  %1130 = vmatprep.mubr.msk.bf16.mxu0 %vm1725_vm1, %v1724_v9 }
 0x25d   : > { %1128 = vmatprep.subr.bf16.mxu0 %v1724_v9 }
 0x260   : > { %1129 = vmatpush3.bf16.msra.mxu0 %v1296_v23 }
 0x263   : > { %1131 = vmatmul.mubr.msk.bf16.vlgmr.msra.gmra.mrb[4].mxu0 %vm551_vm0, %v580_v22 }
 0x32e   : > { %v641_v26 = vpop.f32.mrb[0].mxu0  ;;  %v704_v27 = vpop.f32.mrb[0].mxu1 }
 0x32f   : > { %v642_v28 = vadd.f32 %v1081_v24, %v641_v26  ;;  %v705_v29 = vadd.f32 %v1085_v25, %v704_v27  ;;  %v1116_v30 = vpop.f32.mrb[1].mxu0  ;;  %v1124_v31 = vpop.f32.mrb[1].mxu1 }
 0x330   : > { %v644_v32 = vpop.f32.mrb[2].mxu0  ;;  %v707_v33 = vpop.f32.mrb[2].mxu1 }
 0x331   : > { %v773_v34 = vpack.c.bf16 %v642_v28, %v642_v28  ;;  %v776_v35 = vpack.c.bf16 %v705_v29, %v705_v29  ;;  %v1117_v36 = vpop.f32.mrb[3].mxu0  ;;  %v1125_v37 = vpop.f32.mrb[3].mxu1 }
 0x333   : > { %777 = vst.msk [vmem:[%s539_s29] sm:$0xf] %vm774_vm2, %v776_v35  ;;  %775 = vst.msk [vmem:[%s532_s26] sm:$0xf] %vm774_vm2, %v773_v34 }
 0x334   : > { %1566 = shalt.err (!%p1563_p0)
}
 0x335   : > { %s1567_s11 = scalar_lea.hbm %s2132_s20, 64  ;;  %s1571_s12 = scalar_lea.hbm %s2295_s1, 128 }
 0x336   : > { %p1568_p5 = scmp.ne.s32.totalorder %s2132_s20, %s1567_s11  ;;  %p1572_p13 = scmp.lt.u32.totalorder %s2132_s20, %s2295_s1 }
 0x337   : > { %p1573_p11 = scmp.lt.u32.totalorder %s1571_s12, %s1567_s11  ;;  %p1575_p8 = scmp.lt.u32.totalorder %s1567_s11, %s2132_s20 }
 0x338   : > { %p1569_p7 = pnand %p1568_p5, %p2297_p9 }
 0x339   : > { %p1574_p2 = por %p1573_p11, %p1572_p13 }
 0x33a   : > { %p1570_p10 = pneg %p1569_p7 }
 0x33b   : > { %p1576_p4 = por %p1575_p8, %p1574_p2 }
 0x33d   : > { %p1577_p6 = pnand %p1576_p4, %p1570_p10 }
 0x33f   : > { %1580 = shalt.err (!%p1577_p6)
}
 0x340   : > { %1169 = dma.vmem_to_hbm [thread:$0]  (%p2297_p9), %s2134_s30, 64, %s2132_s20, %s2146_s16  }
 0x341   : > { %s781_s2 = scalar_lea.sflag [#allocation4], %s2087_s27  ;;  %s1581_s4 = scalar_lea.vmem %s2142_s28, 64 }
 0x342   : > { %p1582_p3 = scmp.ne.s32.totalorder %s2142_s28, %s1581_s4  ;;  %s1727_s23 = smov [#allocation17]  }
 0x343   : > { %s1585_s11 = sshll.u32 %s1727_s23, 4  ;;  %s1586_s11 = int_to_ptr.vmem [resolvable:$false] %s1585_s11 }
 0x344   : > { %p1583_p1 = pnand %p1582_p3, %p2297_p9  ;;  %s1587_s29 = scalar_lea.vmem %s1586_s11, 128 }
 0x345   : > { %p1588_p0 = scmp.lt.s32.totalorder %s2142_s28, %s1586_s11  ;;  %p1589_p5 = scmp.lt.s32.totalorder %s1587_s29, %s1581_s4 }
 0x346   : > { %p1584_p12 = pneg %p1583_p1 }
 0x347   : > { %p1590_p7 = por %p1589_p5, %p1588_p0 }
 0x349   : > { %p1591_p10 = pnand %p1590_p7, %p1584_p12 }
 0x34b   : > { %1594 = shalt.err (!%p1591_p10)
}
 0x34c   : > { %s1595_s27 = scalar_lea.hbm %s2140_s0, 64  ;;  %s1599_s26 = scalar_lea.hbm %s2296_s24, 128 }
 0x34d   : > { %p1596_p13 = scmp.ne.s32.totalorder %s2140_s0, %s1595_s27  ;;  %p1600_p8 = scmp.lt.u32.totalorder %s2140_s0, %s2296_s24 }
 0x34e   : > { %p1601_p4 = scmp.lt.u32.totalorder %s1599_s26, %s1595_s27  ;;  %p1603_p3 = scmp.lt.u32.totalorder %s1595_s27, %s2140_s0 }
 0x34f   : > { %p1597_p11 = pnand %p1596_p13, %p2297_p9 }
 0x350   : > { %p1602_p6 = por %p1601_p4, %p1600_p8 }
 0x351   : > { %p1598_p2 = pneg %p1597_p11 }
 0x352   : > { %p1604_p1 = por %p1603_p3, %p1602_p6 }
 0x354   : > { %p1605_p12 = pnand %p1604_p1, %p1598_p2 }
 0x356   : > { %1608 = shalt.err (!%p1605_p12)
}
 0x357   : > { %1168 = dma.vmem_to_hbm [thread:$0]  (%p2297_p9), %s2142_s28, 64, %s2140_s0, %s781_s2   ;;  %v767_v39 = vpop.f32.mrb[4].mxu0 }
 0x358   : > { %s546_s4 = scalar_lea.vmem [#allocation20], %s2120_s3  ;;  %v768_v40 = vadd.f32 %v1089_v38, %v767_v39  ;;  %v1132_v41 = vpop.f32.mrb[5].mxu0  ;;  %s2298_s27 = sld [smem:[#allocation36_spill]] }
 0x359   : > { %s833_s23 = sshll.u32 %s546_s4, 4  ;;  %v770_v42 = vpop.f32.mrb[6].mxu0  ;;  %s1728_s0 = smov [#allocation20]   ;;  %s834_s23 = int_to_ptr.vmem [resolvable:$true] %s833_s23 }
 0x35a   : > { %v778_v43 = vpack.c.bf16 %v768_v40, %v768_v40  ;;  %v1133_v44 = vpop.f32.mrb[7].mxu0  ;;  %s1609_s20 = scalar_lea.vmem %s834_s23, 64  ;;  %s1613_s3 = sshll.u32 %s1728_s0, 4  ;;  %s1614_s3 = int_to_ptr.vmem [resolvable:$false] %s1613_s3 }
 0x35b   : > { %p1610_p0 = scmp.ne.s32.totalorder %s834_s23, %s1609_s20  ;;  %s1615_s28 = scalar_lea.vmem %s1614_s3, 128 }
 0x35c   : > { %779 = vst.msk [vmem:[%s546_s4] sm:$0xf] %vm774_vm2, %v778_v43  ;;  %p1616_p10 = scmp.lt.s32.totalorder %s834_s23, %s1614_s3  ;;  %p1617_p13 = scmp.lt.s32.totalorder %s1615_s28, %s1609_s20 }
 0x35d   : > { %p1611_p5 = pnand %p1610_p0, %p2297_p9 }
 0x35e   : > { %s2197_s30 = scalar_lea.hbm %s2298_s27, %s2124_s9  ;;  %p1618_p11 = por %p1617_p13, %p1616_p10 }
 0x35f   : > { %p1612_p7 = pneg %p1611_p5 }
 0x361   : > { %p1619_p2 = pnand %p1618_p11, %p1612_p7 }
 0x363   : > { %1622 = shalt.err (!%p1619_p2)
}
 0x364   : > { %s1623_s9 = scalar_lea.hbm %s2197_s30, 64  ;;  %s1627_s12 = scalar_lea.hbm %s2298_s27, 128 }
 0x365   : > { %p1624_p8 = scmp.ne.s32.totalorder %s2197_s30, %s1623_s9  ;;  %p1628_p3 = scmp.lt.u32.totalorder %s2197_s30, %s2298_s27 }
 0x366   : > { %p1629_p1 = scmp.lt.u32.totalorder %s1627_s12, %s1623_s9  ;;  %p1631_p0 = scmp.lt.u32.totalorder %s1623_s9, %s2197_s30 }
 0x367   : > { %p1625_p4 = pnand %p1624_p8, %p2297_p9 }
 0x368   : > { %p1630_p12 = por %p1629_p1, %p1628_p3 }
 0x369   : > { %p1626_p6 = pneg %p1625_p4 }
 0x36a   : > { %p1632_p5 = por %p1631_p0, %p1630_p12 }
 0x36c   : > { %p1633_p7 = pnand %p1632_p5, %p1626_p6 }
 0x36e   : > { %1636 = shalt.err (!%p1633_p7)
}
 0x36f   : > { %1170 = dma.vmem_to_hbm [thread:$0]  (%p2297_p9), %s834_s23, 64, %s2197_s30, %s2146_s16  }
 0x370 PF: > { %s845_s11 = sand.u32 1, %s1691_s17   ;;  %p2299_p10 = scmp.ne.s32.totalorder %s2282_s14, 0 }
 0x371   : > { %p2300_p13 = scmp.ge.s32.totalorder %s1711_s22, 2  ;;  %s846_s29 = scalar_lea.sflag [#allocation4], %s845_s11 }
 0x373   : > { %p1204_p11 = pnand %p2300_p13, %p2299_p10 }
 0x375   : > { %1682 = dma.done.wait (!%p1204_p11), %s846_s29, 64  }
 0x376   : > { %1684 = vsyncadd (!%p1204_p11), %s846_s29, 4294967232  ;;  %s2301_s20 = sadd.s32 4294967294, %s1711_s22  }
 0x377   : > { %s854_s0 = sand.u32 1, %s2301_s20  }
 0x378   : > { %s855_s3 = scalar_lea.sflag [#allocation19], %s854_s0 }
 0x379   : > { %1686 = dma.done.wait (!%p1204_p11), %s855_s3, 128  }
 0x37a   : > { %1688 = vsyncadd (!%p1204_p11), %s855_s3, 4294967168  ;;  %s35_s22 = sadd.s32 1, %s1711_s22   ;;  %s2302_s17 = smov %s1695_s18 }
 0x37b   : > { %p32_p9 = scmp.ge.s32.totalorder %s35_s22, 4   ;;  %s2303_s18 = smov %s1699_s19 }
 0x37c   : > { %s2304_s19 = smov %s2037_s15  ;;  %s2305_s20 = smov %s1707_s21 }
 0x37d   : > { %s2306_s21 = smov %s2308_s10  ;;  %34 = sbr.rel (!%p32_p9) target bundleno = 21 (0x15), region = 165 }
 0x384   :  { %869 = vsyncpa [#allocation3], 1 }
 0x385   :  { %871 = vsyncpa [#allocation3 + $0x1], 1 }
 0x386   :  { %872 = vsyncpa [#allocation6], 1 }
 0x387   :  { %873 = vsyncpa [#allocation9], 1 }
 0x388   :  { %874 = vsyncpa [#allocation12], 1 }
 0x389   :  { %875 = vsyncpa [#allocation15], 1 }
 0x38a   :  { %876 = vsyncpa [#allocation4], 1 }
 0x38b   :  { %878 = vsyncpa [#allocation4 + $0x1], 1 }
 0x38c   :  { %879 = vsyncpa [#allocation19], 1 }
 0x38d   :  { %881 = vsyncpa [#allocation19 + $0x1], 1 }

</bundles_post_ra>
